<compile_context>
chip_gen: v7x
topology: tpu7x:2x2x1
jax: 0.10.0
libtpu: 0.0.40
codegen_flags: <defaults>
</compile_context>

<pallas_src>
import jax
import jax.numpy as jnp
from jax import lax
from jax.experimental import pallas as pl
from jax.experimental.pallas import tpu as pltpu

# ----------------------- model hyper-params (small test config) -----------------------
N_FEATS = 16        # n_feats
HIDDEN = 32         # LSTM hidden size
NUM_CLASSES = 8
DENSE = 128         # fixed 128-wide dense layers (as in the PyTorch module)
CONV_K = 10
CONV_STRIDE = 2
CONV_PAD = CONV_K // 2
LN_EPS = 1e-5

LANE = 128          # lane width / padded output width
MAX_ROW_BLK = 512   # upper bound on the fused dense-stack row block


def _round_up(x, m):
    return (x + m - 1) // m * m


# ----------------------------- in-kernel math helpers ---------------------------------
def _gelu(x):
    # exact (erf) GELU, matching F.gelu default
    return 0.5 * x * (1.0 + lax.erf(x * 0.7071067811865476))


def _layernorm(x, g, b):
    mu = jnp.mean(x, axis=-1, keepdims=True)
    var = jnp.mean((x - mu) ** 2, axis=-1, keepdims=True)
    return (x - mu) * lax.rsqrt(var + LN_EPS) * g + b


# --------------------------- kernel 1: fused conv + dense stack -------------------------
def _dense_stack_kernel(cols_ref, wconv_ref, w1_ref, w2_ref, wih_ref, vecs_ref, gx_ref):
    v = vecs_ref[...]                       # packed biases / LN params, f32 (16, 128)
    conv_b = v[0:1, :N_FEATS]
    ln1_g = v[1:2, :N_FEATS]
    ln1_b = v[2:3, :N_FEATS]
    fc1_b = v[3:4, :]
    ln2_g = v[4:5, :]
    ln2_b = v[5:6, :]
    fc2_b = v[6:7, :]
    ln3_g = v[7:8, :]
    ln3_b = v[8:9, :]
    blstm = v[9:10, :]

    # conv (im2col matmul, bf16 operands / f32 accumulation) + LayerNorm(n_feats) + GELU
    y = jnp.dot(cols_ref[...], wconv_ref[...],
                preferred_element_type=jnp.float32) + conv_b
    y = _gelu(_layernorm(y, ln1_g, ln1_b))
    # Linear(n_feats, 128) + LN + GELU
    y = jnp.dot(y.astype(jnp.bfloat16), w1_ref[...],
                preferred_element_type=jnp.float32) + fc1_b
    y = _gelu(_layernorm(y, ln2_g, ln2_b))
    # Linear(128, 128) + LN + GELU
    y = jnp.dot(y.astype(jnp.bfloat16), w2_ref[...],
                preferred_element_type=jnp.float32) + fc2_b
    y = _gelu(_layernorm(y, ln3_g, ln3_b))
    # hoisted LSTM input projection: x @ W_ih^T + (b_ih + b_hh)
    gx_ref[...] = jnp.dot(y.astype(jnp.bfloat16), wih_ref[...],
                          preferred_element_type=jnp.float32) + blstm


def dense_stack(cols_p, wconv, w1, w2, wih_t, vecs, row_blk):
    M_pad, CK = cols_p.shape
    C = wconv.shape[1]
    G = wih_t.shape[1]          # 4*HIDDEN == 128

    def full(shp):
        return pl.BlockSpec(shp, lambda i: (0, 0))

    return pl.pallas_call(
        _dense_stack_kernel,
        grid=(M_pad // row_blk,),
        out_shape=jax.ShapeDtypeStruct((M_pad, G), jnp.float32),
        in_specs=[
            pl.BlockSpec((row_blk, CK), lambda i: (i, 0)),   # im2col rows (bf16)
            full((CK, C)),                                   # conv weight (bf16)
            full((C, DENSE)),                                # fc1 weight (bf16)
            full((DENSE, DENSE)),                            # fc2 weight (bf16)
            full((DENSE, G)),                                # W_ih^T (bf16)
            full((16, LANE)),                                # packed biases/LN (f32)
        ],
        out_specs=pl.BlockSpec((row_blk, G), lambda i: (i, 0)),
        compiler_params=pltpu.CompilerParams(
            dimension_semantics=("parallel",)),
    )(cols_p, wconv, w1, w2, wih_t, vecs)


# ----------------- kernel 2: LSTM recurrence + hoisted LN/GELU + final_fc -----------------
def _lstm_head_kernel(gx_ref, h0_ref, c0_ref, whh_ref, lng_ref, lnb_ref,
                      w3_ref, b3_ref, out_ref, hn_ref, cn_ref, hs_ref):
    T, Bp, G = gx_ref.shape
    H = h0_ref.shape[1]
    whh = whh_ref[...]

    # lane mask for the 'g' gate (PyTorch gate ordering i, f, g, o)
    lane = lax.broadcasted_iota(jnp.int32, (Bp, G), 1)
    tanh_mask = (lane >= 2 * H) & (lane < 3 * H)

    def step(t, carry):
        h, c = carry
        gates = gx_ref[t] + jnp.dot(h, whh, preferred_element_type=jnp.float32)
        # single transcendental pass: tanh(x) = 2*sigmoid(2x) - 1 on g-gate lanes
        z = jnp.where(tanh_mask, 2.0 * gates, gates)
        s = jax.nn.sigmoid(z)
        act = jnp.where(tanh_mask, 2.0 * s - 1.0, s)
        i_g = act[:, 0:H]
        f_g = act[:, H:2 * H]
        g_g = act[:, 2 * H:3 * H]
        o_g = act[:, 3 * H:4 * H]
        c = f_g * c + i_g * g_g
        h = o_g * jnp.tanh(c)
        hs_ref[pl.ds(pl.multiple_of(t * Bp, Bp), Bp), :] = h   # stage h_t for the head
        return (h, c)

    h, c = lax.fori_loop(0, T, step, (h0_ref[...], c0_ref[...]))
    hn_ref[...] = h
    cn_ref[...] = c

    # hoisted head: one batched LayerNorm + GELU + final_fc over all timesteps
    zz = _gelu(_layernorm(hs_ref[...], lng_ref[...], lnb_ref[...]))
    out_ref[...] = jnp.dot(zz, w3_ref[...],
                           preferred_element_type=jnp.float32) + b3_ref[...]


def lstm_head(gx_p, h0_p, c0_p, whh_t, ln_g, ln_b, w3_pad, b3_pad):
    T, Bp, G = gx_p.shape
    H = h0_p.shape[1]
    return pl.pallas_call(
        _lstm_head_kernel,
        grid=(1,),
        out_shape=(
            jax.ShapeDtypeStruct((T * Bp, LANE), jnp.float32),   # lane-dense padded logits
            jax.ShapeDtypeStruct((Bp, H), jnp.float32),          # hn
            jax.ShapeDtypeStruct((Bp, H), jnp.float32),          # cn
        ),
        in_specs=[
            pl.BlockSpec((T, Bp, G), lambda i: (0, 0, 0)),
            pl.BlockSpec((Bp, H), lambda i: (0, 0)),
            pl.BlockSpec((Bp, H), lambda i: (0, 0)),
            pl.BlockSpec((H, G), lambda i: (0, 0)),
            pl.BlockSpec((1, H), lambda i: (0, 0)),
            pl.BlockSpec((1, H), lambda i: (0, 0)),
            pl.BlockSpec((H, LANE), lambda i: (0, 0)),
            pl.BlockSpec((1, LANE), lambda i: (0, 0)),
        ],
        out_specs=(
            pl.BlockSpec((T * Bp, LANE), lambda i: (0, 0)),
            pl.BlockSpec((Bp, H), lambda i: (0, 0)),
            pl.BlockSpec((Bp, H), lambda i: (0, 0)),
        ),
        scratch_shapes=[pltpu.VMEM((T * Bp, H), jnp.float32)],
        compiler_params=pltpu.CompilerParams(
            dimension_semantics=("arbitrary",)),
    )(gx_p, h0_p, c0_p, whh_t, ln_g.reshape(1, H), ln_b.reshape(1, H), w3_pad, b3_pad)


# ------------------------------- im2col (pure data movement) ----------------------------
def im2col(x):
    """x:(B,C,T) -> (T_out*B, C*K) patch matrix with TIME-MAJOR rows (t, b)."""
    B, C, T = x.shape
    x_pad = jnp.pad(x, ((0, 0), (0, 0), (CONV_PAD, CONV_PAD)))
    T_out = (T + 2 * CONV_PAD - CONV_K) // CONV_STRIDE + 1
    starts = jnp.arange(T_out) * CONV_STRIDE
    cols = x_pad[:, :, starts[:, None] + jnp.arange(CONV_K)[None, :]]   # (B,C,T_out,K)
    cols = jnp.transpose(cols, (2, 0, 1, 3)).reshape(T_out * B, C * CONV_K)
    return cols, T_out


# ------------------------------------ full forward --------------------------------------
def speech_recognition_forward(params, x, hidden):
    """x: (B, 1, n_feats, T); hidden = (h0, c0) each (1, B, HIDDEN)."""
    h0, c0 = hidden
    x = x[:, 0]                                   # squeeze(1) -> (B, n_feats, T)
    B, C, T = x.shape
    G = 4 * HIDDEN

    # TODO(synk): im2col is assembled in the XLA wrapper (no lane pad); a fully
    # in-kernel im2col from a raw x time-window would cut HBM reads ~5x more.
    cols, T_out = im2col(x)                       # (T_out*B, C*K) time-major rows
    M = T_out * B
    CK = C * CONV_K

    # row block: as large as possible while keeping >= 2 "parallel" grid steps (v7x 2 TCs)
    row_blk = min(MAX_ROW_BLK, _round_up(max(8, -(-M // 2)), 8))
    M_pad = _round_up(M, row_blk)

    cols_bf = cols.astype(jnp.bfloat16)
    if M_pad == M:
        cols_p = cols_bf
    else:
        cols_p = jnp.zeros((M_pad, CK), jnp.bfloat16).at[:M, :].set(cols_bf)

    # MXU operands in bf16 (accumulation stays f32 inside the kernel)
    wconv = params["conv_w"].reshape(C, C * CONV_K).T.astype(jnp.bfloat16)   # (C*K, C)
    w1 = params["fc1_w"].astype(jnp.bfloat16)
    w2 = params["fc2_w"].astype(jnp.bfloat16)
    wih_t = params["w_ih"].T.astype(jnp.bfloat16)                            # (128, 4H)
    blstm = params["b_ih"] + params["b_hh"]                                  # (4H,)

    # pack all tiny bias / LayerNorm vectors into one (16, 128) f32 slab
    vecs = jnp.zeros((16, LANE), jnp.float32)
    vecs = vecs.at[0, :C].set(params["conv_b"])
    vecs = vecs.at[1, :C].set(params["ln1_g"])
    vecs = vecs.at[2, :C].set(params["ln1_b"])
    vecs = vecs.at[3, :].set(params["fc1_b"])
    vecs = vecs.at[4, :].set(params["ln2_g"])
    vecs = vecs.at[5, :].set(params["ln2_b"])
    vecs = vecs.at[6, :].set(params["fc2_b"])
    vecs = vecs.at[7, :].set(params["ln3_g"])
    vecs = vecs.at[8, :].set(params["ln3_b"])
    vecs = vecs.at[9, :].set(blstm)

    # Kernel 1: conv-matmul + LN/GELU + fc1 + LN/GELU + fc2 + LN/GELU + W_ih projection
    gx = dense_stack(cols_p, wconv, w1, w2, wih_t, vecs, row_blk)   # (M_pad, 4H) f32

    # time-major rows -> (T_out, B, 4H) with no transpose; pad batch to 8 sublanes
    B_pad = _round_up(B, 8)
    if B_pad == B:
        gx_p = gx[:M].reshape(T_out, B_pad, G)
        h0_p, c0_p = h0[0], c0[0]
    else:
        gx3 = gx[:M].reshape(T_out, B, G)
        gx_p = jnp.zeros((T_out, B_pad, G), jnp.float32).at[:, :B, :].set(gx3)
        h0_p = jnp.zeros((B_pad, HIDDEN), jnp.float32).at[:B].set(h0[0])
        c0_p = jnp.zeros((B_pad, HIDDEN), jnp.float32).at[:B].set(c0[0])

    whh_t = params["w_hh"].T                      # (H, 4H)
    w3_pad = jnp.zeros((HIDDEN, LANE), jnp.float32).at[:, :NUM_CLASSES].set(params["fc3_w"])
    b3_pad = jnp.zeros((1, LANE), jnp.float32).at[0, :NUM_CLASSES].set(params["fc3_b"])

    # Kernel 2: LSTM recurrence + hoisted layer_norm2 + GELU + final_fc
    out_pad, hn_p, cn_p = lstm_head(gx_p, h0_p, c0_p, whh_t,
                                    params["ln4_g"], params["ln4_b"], w3_pad, b3_pad)

    out = out_pad.reshape(T_out, B_pad, LANE)
    logits = out[:, :B, :NUM_CLASSES]             # (T_out, B, num_classes)
    return logits, (hn_p[:B][None], cn_p[:B][None])


# ------------------------------------ param init ----------------------------------------
def init_params(key):
    ks = jax.random.split(key, 12)
    s = 0.05
    return {
        # Conv1d(n_feats, n_feats, 10)
        "conv_w": s * jax.random.normal(ks[0], (N_FEATS, N_FEATS, CONV_K), jnp.float32),
        "conv_b": s * jax.random.normal(ks[1], (N_FEATS,), jnp.float32),
        "ln1_g": jnp.ones((N_FEATS,), jnp.float32),
        "ln1_b": jnp.zeros((N_FEATS,), jnp.float32),
        # dense (weights stored as (in, out))
        "fc1_w": s * jax.random.normal(ks[2], (N_FEATS, DENSE), jnp.float32),
        "fc1_b": s * jax.random.normal(ks[3], (DENSE,), jnp.float32),
        "ln2_g": jnp.ones((DENSE,), jnp.float32),
        "ln2_b": jnp.zeros((DENSE,), jnp.float32),
        "fc2_w": s * jax.random.normal(ks[4], (DENSE, DENSE), jnp.float32),
        "fc2_b": s * jax.random.normal(ks[5], (DENSE,), jnp.float32),
        "ln3_g": jnp.ones((DENSE,), jnp.float32),
        "ln3_b": jnp.zeros((DENSE,), jnp.float32),
        # LSTM (PyTorch layout: (4H, in), (4H, H))
        "w_ih": s * jax.random.normal(ks[6], (4 * HIDDEN, DENSE), jnp.float32),
        "w_hh": s * jax.random.normal(ks[7], (4 * HIDDEN, HIDDEN), jnp.float32),
        "b_ih": s * jax.random.normal(ks[8], (4 * HIDDEN,), jnp.float32),
        "b_hh": s * jax.random.normal(ks[9], (4 * HIDDEN,), jnp.float32),
        # layer_norm2 + final_fc
        "ln4_g": jnp.ones((HIDDEN,), jnp.float32),
        "ln4_b": jnp.zeros((HIDDEN,), jnp.float32),
        "fc3_w": s * jax.random.normal(ks[10], (HIDDEN, NUM_CLASSES), jnp.float32),
        "fc3_b": s * jax.random.normal(ks[11], (NUM_CLASSES,), jnp.float32),
    }


# ---------------------------------------- main -------------------------------------------
if __name__ == "__main__":
    key = jax.random.PRNGKey(0)
    kx, kp = jax.random.split(key)

    B, T = 2, 16
    x = jax.random.normal(kx, (B, 1, N_FEATS, T), jnp.float32)
    h0 = jnp.zeros((1, B, HIDDEN), jnp.float32)
    c0 = jnp.zeros((1, B, HIDDEN), jnp.float32)
    params = init_params(kp)

    fwd = jax.jit(speech_recognition_forward)
    logits, (hn, cn) = fwd(params, x, (h0, c0))
    jax.block_until_ready((logits, hn, cn))

    T_out = T // CONV_STRIDE + 1
    assert logits.shape == (T_out, B, NUM_CLASSES), logits.shape
    assert hn.shape == (1, B, HIDDEN) and cn.shape == (1, B, HIDDEN)
    assert bool(jnp.all(jnp.isfinite(logits)))
    print("KERNEL_OK")
</pallas_src>

<mosaic_0001>
module attributes {stable_mosaic.version = 11 : i64} {
  func.func @_dense_stack_kernel(%arg0: i32, %arg1: memref<16x160xbf16, #tpu.memory_space<vmem>>, %arg2: memref<160x16xbf16, #tpu.memory_space<vmem>>, %arg3: memref<16x128xbf16, #tpu.memory_space<vmem>>, %arg4: memref<128x128xbf16, #tpu.memory_space<vmem>>, %arg5: memref<128x128xbf16, #tpu.memory_space<vmem>>, %arg6: memref<16x128xf32, #tpu.memory_space<vmem>>, %arg7: memref<16x128xf32, #tpu.memory_space<vmem>>) attributes {dimension_semantics = [#tpu.dimension_semantics<parallel>], iteration_bounds = array<i64: 2>, scalar_prefetch = 0 : i64, scratch_operands = 0 : i64, tpu.core_type = #tpu.core_type<tc>, window_params = [{transform_indices = @transform_0, window_bounds = array<i64: 16, 160>}, {pipeline_mode = #tpu.pipeline_mode<synchronous>, transform_indices = @transform_1, window_bounds = array<i64: 160, 16>}, {pipeline_mode = #tpu.pipeline_mode<synchronous>, transform_indices = @transform_2, window_bounds = array<i64: 16, 128>}, {pipeline_mode = #tpu.pipeline_mode<synchronous>, transform_indices = @transform_3, window_bounds = array<i64: 128, 128>}, {pipeline_mode = #tpu.pipeline_mode<synchronous>, transform_indices = @transform_4, window_bounds = array<i64: 128, 128>}, {pipeline_mode = #tpu.pipeline_mode<synchronous>, transform_indices = @transform_5, window_bounds = array<i64: 16, 128>}, {transform_indices = @transform_6, window_bounds = array<i64: 16, 128>}]} {
    %c0 = arith.constant 0 : index
    %c0_0 = arith.constant 0 : index
    %0 = vector.load %arg6[%c0, %c0_0] : memref<16x128xf32, #tpu.memory_space<vmem>>, vector<16x128xf32>
    %1 = vector.extract_strided_slice %0 {offsets = [0, 0], sizes = [1, 16], strides = [1, 1]} : vector<16x128xf32> to vector<1x16xf32>
    %2 = vector.extract_strided_slice %0 {offsets = [1, 0], sizes = [1, 16], strides = [1, 1]} : vector<16x128xf32> to vector<1x16xf32>
    %3 = vector.extract_strided_slice %0 {offsets = [2, 0], sizes = [1, 16], strides = [1, 1]} : vector<16x128xf32> to vector<1x16xf32>
    %4 = vector.extract_strided_slice %0 {offsets = [3, 0], sizes = [1, 128], strides = [1, 1]} : vector<16x128xf32> to vector<1x128xf32>
    %5 = vector.extract_strided_slice %0 {offsets = [4, 0], sizes = [1, 128], strides = [1, 1]} : vector<16x128xf32> to vector<1x128xf32>
    %6 = vector.extract_strided_slice %0 {offsets = [5, 0], sizes = [1, 128], strides = [1, 1]} : vector<16x128xf32> to vector<1x128xf32>
    %7 = vector.extract_strided_slice %0 {offsets = [6, 0], sizes = [1, 128], strides = [1, 1]} : vector<16x128xf32> to vector<1x128xf32>
    %8 = vector.extract_strided_slice %0 {offsets = [7, 0], sizes = [1, 128], strides = [1, 1]} : vector<16x128xf32> to vector<1x128xf32>
    %9 = vector.extract_strided_slice %0 {offsets = [8, 0], sizes = [1, 128], strides = [1, 1]} : vector<16x128xf32> to vector<1x128xf32>
    %10 = vector.extract_strided_slice %0 {offsets = [9, 0], sizes = [1, 128], strides = [1, 1]} : vector<16x128xf32> to vector<1x128xf32>
    %c0_1 = arith.constant 0 : index
    %c0_2 = arith.constant 0 : index
    %11 = vector.load %arg1[%c0_1, %c0_2] : memref<16x160xbf16, #tpu.memory_space<vmem>>, vector<16x160xbf16>
    %c0_3 = arith.constant 0 : index
    %c0_4 = arith.constant 0 : index
    %12 = vector.load %arg2[%c0_3, %c0_4] : memref<160x16xbf16, #tpu.memory_space<vmem>>, vector<160x16xbf16>
    %cst = arith.constant dense<0.000000e+00> : vector<16x16xf32>
    %13 = tpu.matmul %11, %12, %cst {dimension_numbers = #tpu.dot_dimension_numbers<[1], [0], [0], [1], [0, 0, 1, 1], [], []>} : vector<16x160xbf16>, vector<160x16xbf16>, vector<16x16xf32> -> vector<16x16xf32>
    %14 = vector.broadcast %1 : vector<1x16xf32> to vector<16x16xf32>
    %15 = arith.addf %13, %14 : vector<16x16xf32>
    %cst_5 = arith.constant dense<0.000000e+00> : vector<16xf32>
    %16 = vector.multi_reduction <add>, %15, %cst_5 [1] : vector<16x16xf32> to vector<16xf32>
    %17 = vector.shape_cast %16 : vector<16xf32> to vector<16x1xf32>
    %cst_6 = arith.constant 1.600000e+01 : f32
    %18 = vector.broadcast %cst_6 : f32 to vector<16x1xf32>
    %19 = arith.divf %17, %18 : vector<16x1xf32>
    %20 = vector.broadcast %19 : vector<16x1xf32> to vector<16x16xf32>
    %21 = arith.subf %15, %20 : vector<16x16xf32>
    %22 = arith.mulf %21, %21 : vector<16x16xf32>
    %cst_7 = arith.constant dense<0.000000e+00> : vector<16xf32>
    %23 = vector.multi_reduction <add>, %22, %cst_7 [1] : vector<16x16xf32> to vector<16xf32>
    %24 = vector.shape_cast %23 : vector<16xf32> to vector<16x1xf32>
    %cst_8 = arith.constant 1.600000e+01 : f32
    %25 = vector.broadcast %cst_8 : f32 to vector<16x1xf32>
    %26 = arith.divf %24, %25 : vector<16x1xf32>
    %27 = vector.broadcast %19 : vector<16x1xf32> to vector<16x16xf32>
    %28 = arith.subf %15, %27 : vector<16x16xf32>
    %cst_9 = arith.constant 9.99999974E-6 : f32
    %29 = vector.broadcast %cst_9 : f32 to vector<16x1xf32>
    %30 = arith.addf %26, %29 : vector<16x1xf32>
    %31 = math.rsqrt %30 : vector<16x1xf32>
    %32 = vector.broadcast %31 : vector<16x1xf32> to vector<16x16xf32>
    %33 = arith.mulf %28, %32 : vector<16x16xf32>
    %34 = vector.broadcast %2 : vector<1x16xf32> to vector<16x16xf32>
    %35 = arith.mulf %33, %34 : vector<16x16xf32>
    %36 = vector.broadcast %3 : vector<1x16xf32> to vector<16x16xf32>
    %37 = arith.addf %35, %36 : vector<16x16xf32>
    %cst_10 = arith.constant 5.000000e-01 : f32
    %38 = vector.broadcast %cst_10 : f32 to vector<16x16xf32>
    %39 = arith.mulf %38, %37 : vector<16x16xf32>
    %cst_11 = arith.constant 0.707106769 : f32
    %40 = vector.broadcast %cst_11 : f32 to vector<16x16xf32>
    %41 = arith.mulf %37, %40 : vector<16x16xf32>
    %42 = math.erf %41 : vector<16x16xf32>
    %cst_12 = arith.constant 1.000000e+00 : f32
    %43 = vector.broadcast %cst_12 : f32 to vector<16x16xf32>
    %44 = arith.addf %43, %42 : vector<16x16xf32>
    %45 = arith.mulf %39, %44 : vector<16x16xf32>
    %46 = arith.truncf %45 : vector<16x16xf32> to vector<16x16xbf16>
    %c0_13 = arith.constant 0 : index
    %c0_14 = arith.constant 0 : index
    %47 = vector.load %arg3[%c0_13, %c0_14] : memref<16x128xbf16, #tpu.memory_space<vmem>>, vector<16x128xbf16>
    %cst_15 = arith.constant dense<0.000000e+00> : vector<16x128xf32>
    %48 = tpu.matmul %46, %47, %cst_15 {dimension_numbers = #tpu.dot_dimension_numbers<[1], [0], [0], [1], [0, 0, 1, 1], [], []>} : vector<16x16xbf16>, vector<16x128xbf16>, vector<16x128xf32> -> vector<16x128xf32>
    %49 = vector.broadcast %4 : vector<1x128xf32> to vector<16x128xf32>
    %50 = arith.addf %48, %49 : vector<16x128xf32>
    %cst_16 = arith.constant dense<0.000000e+00> : vector<16xf32>
    %51 = vector.multi_reduction <add>, %50, %cst_16 [1] : vector<16x128xf32> to vector<16xf32>
    %52 = vector.shape_cast %51 : vector<16xf32> to vector<16x1xf32>
    %cst_17 = arith.constant 1.280000e+02 : f32
    %53 = vector.broadcast %cst_17 : f32 to vector<16x1xf32>
    %54 = arith.divf %52, %53 : vector<16x1xf32>
    %55 = vector.broadcast %54 : vector<16x1xf32> to vector<16x128xf32>
    %56 = arith.subf %50, %55 : vector<16x128xf32>
    %57 = arith.mulf %56, %56 : vector<16x128xf32>
    %cst_18 = arith.constant dense<0.000000e+00> : vector<16xf32>
    %58 = vector.multi_reduction <add>, %57, %cst_18 [1] : vector<16x128xf32> to vector<16xf32>
    %59 = vector.shape_cast %58 : vector<16xf32> to vector<16x1xf32>
    %cst_19 = arith.constant 1.280000e+02 : f32
    %60 = vector.broadcast %cst_19 : f32 to vector<16x1xf32>
    %61 = arith.divf %59, %60 : vector<16x1xf32>
    %62 = vector.broadcast %54 : vector<16x1xf32> to vector<16x128xf32>
    %63 = arith.subf %50, %62 : vector<16x128xf32>
    %cst_20 = arith.constant 9.99999974E-6 : f32
    %64 = vector.broadcast %cst_20 : f32 to vector<16x1xf32>
    %65 = arith.addf %61, %64 : vector<16x1xf32>
    %66 = math.rsqrt %65 : vector<16x1xf32>
    %67 = vector.broadcast %66 : vector<16x1xf32> to vector<16x128xf32>
    %68 = arith.mulf %63, %67 : vector<16x128xf32>
    %69 = vector.broadcast %5 : vector<1x128xf32> to vector<16x128xf32>
    %70 = arith.mulf %68, %69 : vector<16x128xf32>
    %71 = vector.broadcast %6 : vector<1x128xf32> to vector<16x128xf32>
    %72 = arith.addf %70, %71 : vector<16x128xf32>
    %cst_21 = arith.constant 5.000000e-01 : f32
    %73 = vector.broadcast %cst_21 : f32 to vector<16x128xf32>
    %74 = arith.mulf %73, %72 : vector<16x128xf32>
    %cst_22 = arith.constant 0.707106769 : f32
    %75 = vector.broadcast %cst_22 : f32 to vector<16x128xf32>
    %76 = arith.mulf %72, %75 : vector<16x128xf32>
    %77 = math.erf %76 : vector<16x128xf32>
    %cst_23 = arith.constant 1.000000e+00 : f32
    %78 = vector.broadcast %cst_23 : f32 to vector<16x128xf32>
    %79 = arith.addf %78, %77 : vector<16x128xf32>
    %80 = arith.mulf %74, %79 : vector<16x128xf32>
    %81 = arith.truncf %80 : vector<16x128xf32> to vector<16x128xbf16>
    %c0_24 = arith.constant 0 : index
    %c0_25 = arith.constant 0 : index
    %82 = vector.load %arg4[%c0_24, %c0_25] : memref<128x128xbf16, #tpu.memory_space<vmem>>, vector<128x128xbf16>
    %cst_26 = arith.constant dense<0.000000e+00> : vector<16x128xf32>
    %83 = tpu.matmul %81, %82, %cst_26 {dimension_numbers = #tpu.dot_dimension_numbers<[1], [0], [0], [1], [0, 0, 1, 1], [], []>} : vector<16x128xbf16>, vector<128x128xbf16>, vector<16x128xf32> -> vector<16x128xf32>
    %84 = vector.broadcast %7 : vector<1x128xf32> to vector<16x128xf32>
    %85 = arith.addf %83, %84 : vector<16x128xf32>
    %cst_27 = arith.constant dense<0.000000e+00> : vector<16xf32>
    %86 = vector.multi_reduction <add>, %85, %cst_27 [1] : vector<16x128xf32> to vector<16xf32>
    %87 = vector.shape_cast %86 : vector<16xf32> to vector<16x1xf32>
    %cst_28 = arith.constant 1.280000e+02 : f32
    %88 = vector.broadcast %cst_28 : f32 to vector<16x1xf32>
    %89 = arith.divf %87, %88 : vector<16x1xf32>
    %90 = vector.broadcast %89 : vector<16x1xf32> to vector<16x128xf32>
    %91 = arith.subf %85, %90 : vector<16x128xf32>
    %92 = arith.mulf %91, %91 : vector<16x128xf32>
    %cst_29 = arith.constant dense<0.000000e+00> : vector<16xf32>
    %93 = vector.multi_reduction <add>, %92, %cst_29 [1] : vector<16x128xf32> to vector<16xf32>
    %94 = vector.shape_cast %93 : vector<16xf32> to vector<16x1xf32>
    %cst_30 = arith.constant 1.280000e+02 : f32
    %95 = vector.broadcast %cst_30 : f32 to vector<16x1xf32>
    %96 = arith.divf %94, %95 : vector<16x1xf32>
    %97 = vector.broadcast %89 : vector<16x1xf32> to vector<16x128xf32>
    %98 = arith.subf %85, %97 : vector<16x128xf32>
    %cst_31 = arith.constant 9.99999974E-6 : f32
    %99 = vector.broadcast %cst_31 : f32 to vector<16x1xf32>
    %100 = arith.addf %96, %99 : vector<16x1xf32>
    %101 = math.rsqrt %100 : vector<16x1xf32>
    %102 = vector.broadcast %101 : vector<16x1xf32> to vector<16x128xf32>
    %103 = arith.mulf %98, %102 : vector<16x128xf32>
    %104 = vector.broadcast %8 : vector<1x128xf32> to vector<16x128xf32>
    %105 = arith.mulf %103, %104 : vector<16x128xf32>
    %106 = vector.broadcast %9 : vector<1x128xf32> to vector<16x128xf32>
    %107 = arith.addf %105, %106 : vector<16x128xf32>
    %cst_32 = arith.constant 5.000000e-01 : f32
    %108 = vector.broadcast %cst_32 : f32 to vector<16x128xf32>
    %109 = arith.mulf %108, %107 : vector<16x128xf32>
    %cst_33 = arith.constant 0.707106769 : f32
    %110 = vector.broadcast %cst_33 : f32 to vector<16x128xf32>
    %111 = arith.mulf %107, %110 : vector<16x128xf32>
    %112 = math.erf %111 : vector<16x128xf32>
    %cst_34 = arith.constant 1.000000e+00 : f32
    %113 = vector.broadcast %cst_34 : f32 to vector<16x128xf32>
    %114 = arith.addf %113, %112 : vector<16x128xf32>
    %115 = arith.mulf %109, %114 : vector<16x128xf32>
    %116 = arith.truncf %115 : vector<16x128xf32> to vector<16x128xbf16>
    %c0_35 = arith.constant 0 : index
    %c0_36 = arith.constant 0 : index
    %117 = vector.load %arg5[%c0_35, %c0_36] : memref<128x128xbf16, #tpu.memory_space<vmem>>, vector<128x128xbf16>
    %cst_37 = arith.constant dense<0.000000e+00> : vector<16x128xf32>
    %118 = tpu.matmul %116, %117, %cst_37 {dimension_numbers = #tpu.dot_dimension_numbers<[1], [0], [0], [1], [0, 0, 1, 1], [], []>} : vector<16x128xbf16>, vector<128x128xbf16>, vector<16x128xf32> -> vector<16x128xf32>
    %119 = vector.broadcast %10 : vector<1x128xf32> to vector<16x128xf32>
    %120 = arith.addf %118, %119 : vector<16x128xf32>
    %c0_38 = arith.constant 0 : index
    %c0_39 = arith.constant 0 : index
    %121 = vector.load %arg7[%c0_38, %c0_39] : memref<16x128xf32, #tpu.memory_space<vmem>>, vector<16x128xf32>
    tpu.vector_store %arg7[%c0_38, %c0_39], %120 {strides = array<i32>} : memref<16x128xf32, #tpu.memory_space<vmem>>, vector<16x128xf32>,
    return
  }
  func.func @transform_0(%arg0: i32) -> (i32, i32) {
    %c0_i32 = arith.constant 0 : i32
    %c0_i32_0 = arith.constant 0 : i32
    return %arg0, %c0_i32 : i32, i32
  }
  func.func @transform_1(%arg0: i32) -> (i32, i32) {
    %c0_i32 = arith.constant 0 : i32
    %c0_i32_0 = arith.constant 0 : i32
    %c0_i32_1 = arith.constant 0 : i32
    return %c0_i32, %c0_i32_0 : i32, i32
  }
  func.func @transform_2(%arg0: i32) -> (i32, i32) {
    %c0_i32 = arith.constant 0 : i32
    %c0_i32_0 = arith.constant 0 : i32
    %c0_i32_1 = arith.constant 0 : i32
    return %c0_i32, %c0_i32_0 : i32, i32
  }
  func.func @transform_3(%arg0: i32) -> (i32, i32) {
    %c0_i32 = arith.constant 0 : i32
    %c0_i32_0 = arith.constant 0 : i32
    %c0_i32_1 = arith.constant 0 : i32
    return %c0_i32, %c0_i32_0 : i32, i32
  }
  func.func @transform_4(%arg0: i32) -> (i32, i32) {
    %c0_i32 = arith.constant 0 : i32
    %c0_i32_0 = arith.constant 0 : i32
    %c0_i32_1 = arith.constant 0 : i32
    return %c0_i32, %c0_i32_0 : i32, i32
  }
  func.func @transform_5(%arg0: i32) -> (i32, i32) {
    %c0_i32 = arith.constant 0 : i32
    %c0_i32_0 = arith.constant 0 : i32
    %c0_i32_1 = arith.constant 0 : i32
    return %c0_i32, %c0_i32_0 : i32, i32
  }
  func.func @transform_6(%arg0: i32) -> (i32, i32) {
    %c0_i32 = arith.constant 0 : i32
    %c0_i32_0 = arith.constant 0 : i32
    return %arg0, %c0_i32 : i32, i32
  }
}

module attributes {stable_mosaic.version = 11 : i64} {
  func.func @_lstm_head_kernel(%arg0: i32, %arg1: memref<9x8x128xf32, #tpu.memory_space<vmem>>, %arg2: memref<8x32xf32, #tpu.memory_space<vmem>>, %arg3: memref<8x32xf32, #tpu.memory_space<vmem>>, %arg4: memref<32x128xf32, #tpu.memory_space<vmem>>, %arg5: memref<1x32xf32, #tpu.memory_space<vmem>>, %arg6: memref<1x32xf32, #tpu.memory_space<vmem>>, %arg7: memref<32x128xf32, #tpu.memory_space<vmem>>, %arg8: memref<1x128xf32, #tpu.memory_space<vmem>>, %arg9: memref<72x128xf32, #tpu.memory_space<vmem>>, %arg10: memref<8x32xf32, #tpu.memory_space<vmem>>, %arg11: memref<8x32xf32, #tpu.memory_space<vmem>>, %arg12: memref<72x32xf32, #tpu.memory_space<vmem>>) attributes {dimension_semantics = [#tpu.dimension_semantics<arbitrary>], iteration_bounds = array<i64: 1>, scalar_prefetch = 0 : i64, scratch_operands = 1 : i64, tpu.core_type = #tpu.core_type<tc>, window_params = [{pipeline_mode = #tpu.pipeline_mode<synchronous>, transform_indices = @transform_0, window_bounds = array<i64: 9, 8, 128>}, {pipeline_mode = #tpu.pipeline_mode<synchronous>, transform_indices = @transform_1, window_bounds = array<i64: 8, 32>}, {pipeline_mode = #tpu.pipeline_mode<synchronous>, transform_indices = @transform_2, window_bounds = array<i64: 8, 32>}, {pipeline_mode = #tpu.pipeline_mode<synchronous>, transform_indices = @transform_3, window_bounds = array<i64: 32, 128>}, {pipeline_mode = #tpu.pipeline_mode<synchronous>, transform_indices = @transform_4, window_bounds = array<i64: 1, 32>}, {pipeline_mode = #tpu.pipeline_mode<synchronous>, transform_indices = @transform_5, window_bounds = array<i64: 1, 32>}, {pipeline_mode = #tpu.pipeline_mode<synchronous>, transform_indices = @transform_6, window_bounds = array<i64: 32, 128>}, {pipeline_mode = #tpu.pipeline_mode<synchronous>, transform_indices = @transform_7, window_bounds = array<i64: 1, 128>}, {pipeline_mode = #tpu.pipeline_mode<synchronous>, transform_indices = @transform_8, window_bounds = array<i64: 72, 128>}, {pipeline_mode = #tpu.pipeline_mode<synchronous>, transform_indices = @transform_9, window_bounds = array<i64: 8, 32>}, {pipeline_mode = #tpu.pipeline_mode<synchronous>, transform_indices = @transform_10, window_bounds = array<i64: 8, 32>}]} {
    %c0 = arith.constant 0 : index
    %c0_0 = arith.constant 0 : index
    %0 = vector.load %arg4[%c0, %c0_0] : memref<32x128xf32, #tpu.memory_space<vmem>>, vector<32x128xf32>
    %1 = tpu.iota {dimensions = array<i32: 1>} : vector<8x128xi32>
    %c64_i32 = arith.constant 64 : i32
    %2 = vector.broadcast %c64_i32 : i32 to vector<8x128xi32>
    %3 = arith.cmpi sge, %1, %2 : vector<8x128xi32>
    %c96_i32 = arith.constant 96 : i32
    %4 = vector.broadcast %c96_i32 : i32 to vector<8x128xi32>
    %5 = arith.cmpi slt, %1, %4 : vector<8x128xi32>
    %6 = arith.andi %3, %5 : vector<8x128xi1>
    %c0_1 = arith.constant 0 : index
    %c0_2 = arith.constant 0 : index
    %7 = vector.load %arg2[%c0_1, %c0_2] : memref<8x32xf32, #tpu.memory_space<vmem>>, vector<8x32xf32>
    %c0_3 = arith.constant 0 : index
    %c0_4 = arith.constant 0 : index
    %8 = vector.load %arg3[%c0_3, %c0_4] : memref<8x32xf32, #tpu.memory_space<vmem>>, vector<8x32xf32>
    %c0_i32 = arith.constant 0 : i32
    %c9_i32 = arith.constant 9 : i32
    %9 = arith.addi %c0_i32, %c9_i32 : i32
    %c1_i32 = arith.constant 1 : i32
    %10:2 = scf.for %arg13 = %c0_i32 to %9 step %c1_i32 iter_args(%arg14 = %7, %arg15 = %8) -> (vector<8x32xf32>, vector<8x32xf32>)  : i32 {
      %52 = arith.index_cast %arg13 : i32 to index
      %c0_30 = arith.constant 0 : index
      %c0_31 = arith.constant 0 : index
      %53 = vector.load %arg1[%52, %c0_30, %c0_31] : memref<9x8x128xf32, #tpu.memory_space<vmem>>, vector<1x8x128xf32>
      %54 = vector.shape_cast %53 : vector<1x8x128xf32> to vector<8x128xf32>
      %cst_32 = arith.constant dense<0.000000e+00> : vector<8x128xf32>
      %55 = tpu.matmul %arg14, %0, %cst_32 {dimension_numbers = #tpu.dot_dimension_numbers<[1], [0], [0], [1], [0, 0, 1, 1], [], []>} : vector<8x32xf32>, vector<32x128xf32>, vector<8x128xf32> -> vector<8x128xf32>
      %56 = arith.addf %54, %55 : vector<8x128xf32>
      %cst_33 = arith.constant 2.000000e+00 : f32
      %57 = vector.broadcast %cst_33 : f32 to vector<8x128xf32>
      %58 = arith.mulf %57, %56 : vector<8x128xf32>
      %59 = arith.select %6, %58, %56 : vector<8x128xi1>, vector<8x128xf32>
      %60 = arith.negf %59 : vector<8x128xf32>
      %61 = math.exp %60 : vector<8x128xf32>
      %cst_34 = arith.constant 1.000000e+00 : f32
      %62 = vector.broadcast %cst_34 : f32 to vector<8x128xf32>
      %63 = arith.addf %62, %61 : vector<8x128xf32>
      %64 = arith.divf %62, %63 : vector<8x128xf32>
      %cst_35 = arith.constant 2.000000e+00 : f32
      %65 = vector.broadcast %cst_35 : f32 to vector<8x128xf32>
      %66 = arith.mulf %65, %64 : vector<8x128xf32>
      %cst_36 = arith.constant 1.000000e+00 : f32
      %67 = vector.broadcast %cst_36 : f32 to vector<8x128xf32>
      %68 = arith.subf %66, %67 : vector<8x128xf32>
      %69 = arith.select %6, %68, %64 : vector<8x128xi1>, vector<8x128xf32>
      %70 = vector.extract_strided_slice %69 {offsets = [0, 0], sizes = [8, 32], strides = [1, 1]} : vector<8x128xf32> to vector<8x32xf32>
      %71 = vector.extract_strided_slice %69 {offsets = [0, 32], sizes = [8, 32], strides = [1, 1]} : vector<8x128xf32> to vector<8x32xf32>
      %72 = vector.extract_strided_slice %69 {offsets = [0, 64], sizes = [8, 32], strides = [1, 1]} : vector<8x128xf32> to vector<8x32xf32>
      %73 = vector.extract_strided_slice %69 {offsets = [0, 96], sizes = [8, 32], strides = [1, 1]} : vector<8x128xf32> to vector<8x32xf32>
      %74 = arith.mulf %71, %arg15 : vector<8x32xf32>
      %75 = arith.mulf %70, %72 : vector<8x32xf32>
      %76 = arith.addf %74, %75 : vector<8x32xf32>
      %77 = math.tanh %76 : vector<8x32xf32>
      %78 = arith.mulf %73, %77 : vector<8x32xf32>
      %c8_i32 = arith.constant 8 : i32
      %79 = arith.muli %arg13, %c8_i32 : i32
      %80 = tpu.assume_multiple %79, 8 : i32
      %81 = arith.index_cast %80 : i32 to index
      %c0_37 = arith.constant 0 : index
      %82 = vector.load %arg12[%81, %c0_37] : memref<72x32xf32, #tpu.memory_space<vmem>>, vector<8x32xf32>
      tpu.vector_store %arg12[%81, %c0_37], %78 {strides = array<i32>} : memref<72x32xf32, #tpu.memory_space<vmem>>, vector<8x32xf32>,
      scf.yield %78, %76 : vector<8x32xf32>, vector<8x32xf32>
    }
    %c9_i32_5 = arith.constant 9 : i32
    %c0_6 = arith.constant 0 : index
    %c0_7 = arith.constant 0 : index
    %11 = vector.load %arg10[%c0_6, %c0_7] : memref<8x32xf32, #tpu.memory_space<vmem>>, vector<8x32xf32>
    tpu.vector_store %arg10[%c0_6, %c0_7], %10#0 {strides = array<i32>} : memref<8x32xf32, #tpu.memory_space<vmem>>, vector<8x32xf32>,
    %c0_8 = arith.constant 0 : index
    %c0_9 = arith.constant 0 : index
    %12 = vector.load %arg11[%c0_8, %c0_9] : memref<8x32xf32, #tpu.memory_space<vmem>>, vector<8x32xf32>
    tpu.vector_store %arg11[%c0_8, %c0_9], %10#1 {strides = array<i32>} : memref<8x32xf32, #tpu.memory_space<vmem>>, vector<8x32xf32>,
    %c0_10 = arith.constant 0 : index
    %c0_11 = arith.constant 0 : index
    %13 = vector.load %arg12[%c0_10, %c0_11] : memref<72x32xf32, #tpu.memory_space<vmem>>, vector<72x32xf32>
    %c0_12 = arith.constant 0 : index
    %c0_13 = arith.constant 0 : index
    %14 = vector.load %arg5[%c0_12, %c0_13] : memref<1x32xf32, #tpu.memory_space<vmem>>, vector<1x32xf32>
    %c0_14 = arith.constant 0 : index
    %c0_15 = arith.constant 0 : index
    %15 = vector.load %arg6[%c0_14, %c0_15] : memref<1x32xf32, #tpu.memory_space<vmem>>, vector<1x32xf32>
    %cst = arith.constant dense<0.000000e+00> : vector<72xf32>
    %16 = vector.multi_reduction <add>, %13, %cst [1] : vector<72x32xf32> to vector<72xf32>
    %17 = vector.shape_cast %16 : vector<72xf32> to vector<72x1xf32>
    %cst_16 = arith.constant 3.200000e+01 : f32
    %18 = vector.broadcast %cst_16 : f32 to vector<72x1xf32>
    %19 = arith.divf %17, %18 : vector<72x1xf32>
    %20 = vector.broadcast %19 : vector<72x1xf32> to vector<72x32xf32>
    %21 = arith.subf %13, %20 : vector<72x32xf32>
    %22 = arith.mulf %21, %21 : vector<72x32xf32>
    %cst_17 = arith.constant dense<0.000000e+00> : vector<72xf32>
    %23 = vector.multi_reduction <add>, %22, %cst_17 [1] : vector<72x32xf32> to vector<72xf32>
    %24 = vector.shape_cast %23 : vector<72xf32> to vector<72x1xf32>
    %cst_18 = arith.constant 3.200000e+01 : f32
    %25 = vector.broadcast %cst_18 : f32 to vector<72x1xf32>
    %26 = arith.divf %24, %25 : vector<72x1xf32>
    %27 = vector.broadcast %19 : vector<72x1xf32> to vector<72x32xf32>
    %28 = arith.subf %13, %27 : vector<72x32xf32>
    %cst_19 = arith.constant 9.99999974E-6 : f32
    %29 = vector.broadcast %cst_19 : f32 to vector<72x1xf32>
    %30 = arith.addf %26, %29 : vector<72x1xf32>
    %31 = math.rsqrt %30 : vector<72x1xf32>
    %32 = vector.broadcast %31 : vector<72x1xf32> to vector<72x32xf32>
    %33 = arith.mulf %28, %32 : vector<72x32xf32>
    %34 = vector.broadcast %14 : vector<1x32xf32> to vector<72x32xf32>
    %35 = arith.mulf %33, %34 : vector<72x32xf32>
    %36 = vector.broadcast %15 : vector<1x32xf32> to vector<72x32xf32>
    %37 = arith.addf %35, %36 : vector<72x32xf32>
    %cst_20 = arith.constant 5.000000e-01 : f32
    %38 = vector.broadcast %cst_20 : f32 to vector<72x32xf32>
    %39 = arith.mulf %38, %37 : vector<72x32xf32>
    %cst_21 = arith.constant 0.707106769 : f32
    %40 = vector.broadcast %cst_21 : f32 to vector<72x32xf32>
    %41 = arith.mulf %37, %40 : vector<72x32xf32>
    %42 = math.erf %41 : vector<72x32xf32>
    %cst_22 = arith.constant 1.000000e+00 : f32
    %43 = vector.broadcast %cst_22 : f32 to vector<72x32xf32>
    %44 = arith.addf %43, %42 : vector<72x32xf32>
    %45 = arith.mulf %39, %44 : vector<72x32xf32>
    %c0_23 = arith.constant 0 : index
    %c0_24 = arith.constant 0 : index
    %46 = vector.load %arg7[%c0_23, %c0_24] : memref<32x128xf32, #tpu.memory_space<vmem>>, vector<32x128xf32>
    %cst_25 = arith.constant dense<0.000000e+00> : vector<72x128xf32>
    %47 = tpu.matmul %45, %46, %cst_25 {dimension_numbers = #tpu.dot_dimension_numbers<[1], [0], [0], [1], [0, 0, 1, 1], [], []>} : vector<72x32xf32>, vector<32x128xf32>, vector<72x128xf32> -> vector<72x128xf32>
    %c0_26 = arith.constant 0 : index
    %c0_27 = arith.constant 0 : index
    %48 = vector.load %arg8[%c0_26, %c0_27] : memref<1x128xf32, #tpu.memory_space<vmem>>, vector<1x128xf32>
    %49 = vector.broadcast %48 : vector<1x128xf32> to vector<72x128xf32>
    %50 = arith.addf %47, %49 : vector<72x128xf32>
    %c0_28 = arith.constant 0 : index
    %c0_29 = arith.constant 0 : index
    %51 = vector.load %arg9[%c0_28, %c0_29] : memref<72x128xf32, #tpu.memory_space<vmem>>, vector<72x128xf32>
    tpu.vector_store %arg9[%c0_28, %c0_29], %50 {strides = array<i32>} : memref<72x128xf32, #tpu.memory_space<vmem>>, vector<72x128xf32>,
    return
  }
  func.func @transform_0(%arg0: i32) -> (i32, i32, i32) {
    %c0_i32 = arith.constant 0 : i32
    %c0_i32_0 = arith.constant 0 : i32
    %c0_i32_1 = arith.constant 0 : i32
    %c0_i32_2 = arith.constant 0 : i32
    return %c0_i32, %c0_i32_0, %c0_i32_1 : i32, i32, i32
  }
  func.func @transform_1(%arg0: i32) -> (i32, i32) {
    %c0_i32 = arith.constant 0 : i32
    %c0_i32_0 = arith.constant 0 : i32
    %c0_i32_1 = arith.constant 0 : i32
    return %c0_i32, %c0_i32_0 : i32, i32
  }
  func.func @transform_2(%arg0: i32) -> (i32, i32) {
    %c0_i32 = arith.constant 0 : i32
    %c0_i32_0 = arith.constant 0 : i32
    %c0_i32_1 = arith.constant 0 : i32
    return %c0_i32, %c0_i32_0 : i32, i32
  }
  func.func @transform_3(%arg0: i32) -> (i32, i32) {
    %c0_i32 = arith.constant 0 : i32
    %c0_i32_0 = arith.constant 0 : i32
    %c0_i32_1 = arith.constant 0 : i32
    return %c0_i32, %c0_i32_0 : i32, i32
  }
  func.func @transform_4(%arg0: i32) -> (i32, i32) {
    %c0_i32 = arith.constant 0 : i32
    %c0_i32_0 = arith.constant 0 : i32
    %c0_i32_1 = arith.constant 0 : i32
    return %c0_i32, %c0_i32_0 : i32, i32
  }
  func.func @transform_5(%arg0: i32) -> (i32, i32) {
    %c0_i32 = arith.constant 0 : i32
    %c0_i32_0 = arith.constant 0 : i32
    %c0_i32_1 = arith.constant 0 : i32
    return %c0_i32, %c0_i32_0 : i32, i32
  }
  func.func @transform_6(%arg0: i32) -> (i32, i32) {
    %c0_i32 = arith.constant 0 : i32
    %c0_i32_0 = arith.constant 0 : i32
    %c0_i32_1 = arith.constant 0 : i32
    return %c0_i32, %c0_i32_0 : i32, i32
  }
  func.func @transform_7(%arg0: i32) -> (i32, i32) {
    %c0_i32 = arith.constant 0 : i32
    %c0_i32_0 = arith.constant 0 : i32
    %c0_i32_1 = arith.constant 0 : i32
    return %c0_i32, %c0_i32_0 : i32, i32
  }
  func.func @transform_8(%arg0: i32) -> (i32, i32) {
    %c0_i32 = arith.constant 0 : i32
    %c0_i32_0 = arith.constant 0 : i32
    %c0_i32_1 = arith.constant 0 : i32
    return %c0_i32, %c0_i32_0 : i32, i32
  }
  func.func @transform_9(%arg0: i32) -> (i32, i32) {
    %c0_i32 = arith.constant 0 : i32
    %c0_i32_0 = arith.constant 0 : i32
    %c0_i32_1 = arith.constant 0 : i32
    return %c0_i32, %c0_i32_0 : i32, i32
  }
  func.func @transform_10(%arg0: i32) -> (i32, i32) {
    %c0_i32 = arith.constant 0 : i32
    %c0_i32_0 = arith.constant 0 : i32
    %c0_i32_1 = arith.constant 0 : i32
    return %c0_i32, %c0_i32_0 : i32, i32
  }
}

</mosaic_0001>

<bundles_post_ra>
// kernel: speech_recognition_forward.2
= control target key start
LH: loop header
LB: loop body
LE: loop exit
PB: predicated region body
PF: predicated region fallthrough
CT: control target
= control target key end

     0   :  { %s1096_s21 = smov 0   ;;  %s1263_s0 = inlined_call_operand.vmem [shape: bf16[32,160], index: 0, kind: input, shape index: {}]   ;;  %s1264_s1 = inlined_call_operand.vmem [shape: bf16[160,16], index: 1, kind: input, shape index: {}]   ;;  %s1265_s2 = inlined_call_operand.vmem [shape: bf16[16,128], index: 2, kind: input, shape index: {}]   ;;  %s1266_s3 = inlined_call_operand.vmem [shape: bf16[128,128], index: 3, kind: input, shape index: {}]   ;;  %s1267_s4 = inlined_call_operand.vmem [shape: bf16[128,128], index: 4, kind: input, shape index: {}]   ;;  %s1268_s5 = inlined_call_operand.vmem [shape: f32[16,128], index: 5, kind: input, shape index: {}]   ;;  %s1269_s6 = inlined_call_operand.vmem [shape: f32[32,128], index: 6, kind: output, shape index: {}]  }
   0x1 LB: > { %s875_s22 = sadd.s32 4294967295, %s1056_s21   ;;  %p879_p0 = scmp.ge.s32.totalorder %s1056_s21, 1  ;;  %s1056_s21 = sphi %s1096_s21, %s16_s21  }
   0x2   : > { %p214_p1 = scmp.lt.s32.totalorder %s1056_s21, 3 }
   0x4   : > { %p215_p2 = pnand %p879_p0, %p214_p1 }
   0x5   : > { %v996_v0 = vld [vmem:[%s1264_s1] sm:$0xff] (!%p215_p2)   ;;  %v1058_v1 = vmov (!%p215_p2), 0   ;;  %s880_s25 = sshll.u32 (!%p215_p2), %s875_s22, 1  ;;  %v997_v2 = vld [vmem:[%s1264_s1 + $0x8] sm:$0xff] (!%p215_p2)   ;;  %v998_v3 = vld [vmem:[%s1264_s1 + $0x10] sm:$0xff] (!%p215_p2)   ;;  %vm356_vm0 = vcmask (!%p215_p2), 261120   ;;  %v283_v13 = vlaneseq (!%p215_p2) }
   0x6   : > { %218 = sbr.rel (%p215_p2) target bundleno = 1905 (0x771), region = 44  ;;  %360 = vmatprep.subr.bf16.mxu0 (!%p215_p2), %v1058_v1  ;;  %p246_p3 = scmp.lt.s32.totalorder (!%p215_p2), %s880_s25, 3  ;;  %v999_v4 = vld [vmem:[%s1264_s1 + $0x18] sm:$0xff] (!%p215_p2)   ;;  %v1000_v6 = vld [vmem:[%s1264_s1 + $0x20] sm:$0xff] (!%p215_p2)   ;;  %v1001_v7 = vld [vmem:[%s1264_s1 + $0x28] sm:$0xff] (!%p215_p2)   ;;  %vm401_vm1 = vcmask (!%p215_p2), 130048  }
   0x7   : > { %361 = vmatpush1.bf16.msra.mxu0 (!%p215_p2), %v996_v0  ;;  %v1002_v8 = vld [vmem:[%s1264_s1 + $0x30] sm:$0xff] (!%p215_p2)   ;;  %v1003_v9 = vld [vmem:[%s1264_s1 + $0x38] sm:$0xff] (!%p215_p2)   ;;  %v1004_v10 = vld [vmem:[%s1264_s1 + $0x40] sm:$0xff] (!%p215_p2)   ;;  %v1142_v14 = vshrl.u32 (!%p215_p2), %v283_v13, 7  ;;  %v1059_v37 = vmov (!%p215_p2), 0.0   ;;  %vm1060_vm2 = vmmov (!%p215_p2), 0  }
   0x8   : > { %362 = vmatprep.subr.bf16.mxu0 (!%p215_p2), %v1058_v1  ;;  %v1005_v11 = vld [vmem:[%s1264_s1 + $0x48] sm:$0xff] (!%p215_p2)   ;;  %v1148_v16 = vld [vmem:[%s1268_s5] sm:$0xff] (!%p215_p2)  ;;  %945 = vmatprep.subr.bf16.mxu1 (!%p215_p2), %v1059_v37 }
   0x9   : > { %v285_v15 = vsub.s32 (!%p215_p2), 0, %v1142_v14  ;;  %v1009_v36 = vld [vmem:[%s1265_s2] sm:$0xff] (!%p215_p2)   ;;  %961 = vmatprep.mubr.msk.bf16.mxu1 (!%p215_p2), %vm1060_vm2, %v1059_v37  ;;  %v431_v44 = vsub.s32 (!%p215_p2), 1, %v1142_v14  ;;  %v437_v45 = vsub.s32 (!%p215_p2), 2, %v1142_v14 }
   0xb   : > { %363 = vmatpush1.bf16.msra.mxu0 (!%p215_p2), %v997_v2  ;;  %v286_v17 = vrot.slane (!%p215_p2), %v1148_v16, %v285_v15  ;;  %v432_v46 = vrot.slane (!%p215_p2), %v1148_v16, %v431_v44  ;;  %v438_v48 = vrot.slane (!%p215_p2), %v1148_v16, %v437_v45 }
   0xc   : > { %364 = vmatprep.subr.bf16.mxu0 (!%p215_p2), %v1058_v1 }
   0xd   : > { %s1271_s25 = smov (!%p246_p3, %s880_s25), 3 }
   0xe   : > { %s918_s30 = sshll.u32 %s1271_s25, 3 }
   0xf   : > { %s250_s9 = scalar_lea.vmem %s1263_s0, %s918_s30  ;;  %365 = vmatpush1.bf16.msra.mxu0 %v998_v3  ;;  %v456_v3 = vsub.s32 3, %v1142_v14  ;;  %s256_s23 = scalar_lea.vmem %s1269_s6, %s918_s30 }
  0x10   : > { %366 = vmatprep.subr.bf16.mxu0 %v1058_v1  ;;  %v1008_v5 = vld [vmem:[%s250_s9 + $0x4] ss:$8 sps:$4 sm:$0xff]   ;;  %v1006_v12 = vld [vmem:[%s250_s9] ss:$8 sps:$4 sm:$0xff]  }
  0x11   : > { %897 = vmatprep.mubr.msk.bf16.mxu0 %vm356_vm0, %v1008_v5 }
  0x13   : > { %367 = vmatpush1.bf16.msra.mxu0 %v999_v4  ;;  %v457_v4 = vrot.slane %v1148_v16, %v456_v3 }
  0x14   : > { %368 = vmatprep.subr.bf16.mxu0 %v1058_v1 }
  0x17   : > { %369 = vmatpush1.bf16.msra.mxu0 %v1000_v6 }
  0x18   : > { %370 = vmatprep.subr.bf16.mxu0 %v1058_v1 }
  0x1b   : > { %371 = vmatpush1.bf16.msra.mxu0 %v1001_v7 }
  0x1c   : > { %372 = vmatprep.subr.bf16.mxu0 %v1058_v1 }
  0x1f   : > { %373 = vmatpush1.bf16.msra.mxu0 %v1002_v8 }
  0x20   : > { %374 = vmatprep.subr.bf16.mxu0 %v1058_v1 }
  0x23   : > { %375 = vmatpush1.bf16.msra.mxu0 %v1003_v9 }
  0x24   : > { %376 = vmatprep.subr.bf16.mxu0 %v1058_v1 }
  0x27   : > { %377 = vmatpush1.bf16.msra.mxu0 %v1004_v10 }
  0x28   : > { %378 = vmatprep.subr.bf16.mxu0 %v1058_v1 }
  0x2b   : > { %379 = vmatpush1.bf16.msra.mxu0 %v1005_v11 }
  0x2c   : > { %939 = vmatprep.subr.bf16.mxu0 %v1059_v37 }
  0x2e   : > { %393 = vmatmul.mubr.bf16.vlgmr.msra.gmra.mrb[0].mxu0 %v1006_v12 }
  0x2f   : > { %941 = vmatprep.mubr.msk.bf16.mxu0 %vm1060_vm2, %v1059_v37  ;;  %940 = vmatpush3.bf16.msra.mxu0 %v1009_v36  ;;  %v533_v36 = vsub.s32 4, %v1142_v14 }
 0x101   : > { %v394_v18 = vpop.f32.mrb[0].mxu0 }
 0x102   : > { %v395_v19 = vadd.f32 %v394_v18, %v286_v17  ;;  %v396_v20 = vpop.f32.mrb[1].mxu0 }
 0x103   : > { %v397_v21 = vpop.f32.mrb[2].mxu0 }
 0x104   : > { %v398_v22 = vadd.f32 %v397_v21, %v286_v17  ;;  %v399_v23 = vpop.f32.mrb[3].mxu0  ;;  %v402_v24 = vsel %vm401_vm1, %v395_v19, 0.0 }
 0x105   : > { %403 = vadd.xlane.f32.xlu0 %v402_v24  ;;  %v1011_v23 = vld [vmem:[%s1266_s3 + $0x8] sm:$0xff]   ;;  %v1012_v24 = vld [vmem:[%s1266_s3 + $0x10] sm:$0xff]  }
 0x106   : > { %v405_v25 = vsel %vm401_vm1, %v398_v22, 0.0 }
 0x109   : > { %406 = vadd.xlane.f32.xlu0 %v405_v25  ;;  %v1013_v25 = vld [vmem:[%s1266_s3 + $0x18] sm:$0xff]  }
 0x192   : > { %v404_v26 = vpop.xlane.xlu0 %403 }
 0x193   : > { %v409_v27 = vmul.f32 0.0625, %v404_v26  ;;  %v1014_v26 = vld [vmem:[%s1266_s3 + $0x20] sm:$0xff]  }
 0x195   : > { %v411_v28 = vsub.f32 %v395_v19, %v409_v27  ;;  %v1015_v27 = vld [vmem:[%s1266_s3 + $0x28] sm:$0xff]  }
 0x196   : > { %v407_v29 = vpop.xlane.xlu0 %406 }
 0x197   : > { %v410_v30 = vmul.f32 0.0625, %v407_v29  ;;  %v413_v31 = vmul.f32 %v411_v28, %v411_v28  ;;  %v1017_v29 = vld [vmem:[%s1266_s3 + $0x38] sm:$0xff]  }
 0x199   : > { %v412_v32 = vsub.f32 %v398_v22, %v410_v30  ;;  %v415_v33 = vsel %vm401_vm1, %v413_v31, 0.0  ;;  %v1010_v22 = vld [vmem:[%s1266_s3] sm:$0xff]  }
 0x19a   : > { %416 = vadd.xlane.f32.xlu1 %v415_v33  ;;  %946 = vmatpush3.bf16.msra.mxu1 %v1010_v22  ;;  %v1024_v22 = vld [vmem:[%s1267_s4 + $0x30] sm:$0xff]  }
 0x19b   : > { %v414_v34 = vmul.f32 %v412_v32, %v412_v32  ;;  %947 = vmatprep.subr.bf16.mxu1 %v1059_v37 }
 0x19d   : > { %v418_v35 = vsel %vm401_vm1, %v414_v34, 0.0 }
 0x19e   : > { %419 = vadd.xlane.f32.xlu1 %v418_v35  ;;  %948 = vmatpush3.bf16.msra.mxu1 %v1011_v23  ;;  %v1025_v23 = vld [vmem:[%s1267_s4 + $0x38] sm:$0xff]  }
 0x19f   : > { %949 = vmatprep.subr.bf16.mxu1 %v1059_v37 }
 0x1a2   : > { %950 = vmatpush3.bf16.msra.mxu1 %v1012_v24 }
 0x1a3   : > { %951 = vmatprep.subr.bf16.mxu1 %v1059_v37 }
 0x1a6   : > { %952 = vmatpush3.bf16.msra.mxu1 %v1013_v25 }
 0x1a7   : > { %953 = vmatprep.subr.bf16.mxu1 %v1059_v37 }
 0x1aa   : > { %954 = vmatpush3.bf16.msra.mxu1 %v1014_v26 }
 0x1ab   : > { %955 = vmatprep.subr.bf16.mxu1 %v1059_v37 }
 0x1ae   : > { %956 = vmatpush3.bf16.msra.mxu1 %v1015_v27 }
 0x1af   : > { %957 = vmatprep.subr.bf16.mxu1 %v1059_v37 }
 0x227   : > { %v417_v38 = vpop.xlane.xlu1 %416 }
 0x228   : > { %v421_v39 = vmul.f32 0.0625, %v417_v38  ;;  %v539_v38 = vsub.s32 5, %v1142_v14 }
 0x22a   : > { %v423_v40 = vadd.f32 1e-05, %v421_v39  ;;  %v534_v39 = vrot.slane %v1148_v16, %v533_v36 }
 0x22b   : > { %v420_v41 = vpop.xlane.xlu1 %419 }
 0x22c   : > { %1026 = vrsqrt.f32 %v423_v40  ;;  %v422_v42 = vmul.f32 0.0625, %v420_v41 }
 0x22e   : > { %v424_v43 = vadd.f32 1e-05, %v422_v42  ;;  %v540_v42 = vrot.slane %v1148_v16, %v539_v38 }
 0x230   : > { %1028 = vrsqrt.f32 %v424_v43 }
 0x236   : > { %v1027_v47 = vpop.eup %1026 }
 0x237   : > { %v427_v49 = vmul.f32 %v1027_v47, %v411_v28  ;;  %v1016_v28 = vld [vmem:[%s1266_s3 + $0x30] sm:$0xff]  }
 0x238   : > { %958 = vmatpush3.bf16.msra.mxu1 %v1016_v28 }
 0x239   : > { %v433_v50 = vmul.f32 %v432_v46, %v427_v49  ;;  %959 = vmatprep.subr.bf16.mxu1 %v1059_v37 }
 0x23a   : > { %v1029_v51 = vpop.eup %1028 }
 0x23b   : > { %v439_v52 = vadd.f32 %v438_v48, %v433_v50  ;;  %v428_v53 = vmul.f32 %v1029_v51, %v412_v32 }
 0x23c   : > { %960 = vmatpush3.bf16.msra.mxu1 %v1017_v29 }
 0x23d   : > { %v443_v54 = vmul.f32 0.70710677, %v439_v52  ;;  %v434_v55 = vmul.f32 %v432_v46, %v428_v53  ;;  %v441_v61 = vmul.f32 0.5, %v439_v52  ;;  %965 = vmatprep.subr.bf16.mxu1 %v1059_v37 }
 0x23f   : > { %v440_v56 = vadd.f32 %v438_v48, %v434_v55  ;;  %1030 = verf.f32 %v443_v54 }
 0x241   : > { %v444_v57 = vmul.f32 0.70710677, %v440_v56  ;;  %v442_v62 = vmul.f32 0.5, %v440_v56 }
 0x243   : > { %1032 = verf.f32 %v444_v57 }
 0x249   : > { %v1031_v58 = vpop.eup %1030 }
 0x24a   : > { %v447_v59 = vadd.f32 1.0, %v1031_v58 }
 0x24c   : > { %v449_v0 = vmul.f32 %v447_v59, %v441_v61  ;;  %v572_v61 = vsub.s32 6, %v1142_v14 }
 0x24d   : > { %v1033_v60 = vpop.eup %1032 }
 0x24e   : > { %v448_v63 = vadd.f32 1.0, %v1033_v60 }
 0x250   : > { %v450_v1 = vmul.f32 %v448_v63, %v442_v62  ;;  %v573_v62 = vrot.slane %v1148_v16, %v572_v61 }
 0x252   : > { %v451_v2 = vpack.c.bf16 %v450_v1, %v449_v0 }
 0x254   : > { %942 = vmatmul.mubr.msk.bf16.vlgmr.msra.gmra.mrb[4].mxu0 %vm401_vm1, %v451_v2 }
 0x327   : > { %v501_v5 = vpop.f32.mrb[4].mxu0 }
 0x328   : > { %v502_v6 = vadd.f32 %v501_v5, %v457_v4  ;;  %v943_v7 = vpop.f32.mrb[5].mxu0 }
 0x329   : > { %v504_v8 = vpop.f32.mrb[6].mxu0 }
 0x32a   : > { %v505_v9 = vadd.f32 %v504_v8, %v457_v4  ;;  %508 = vadd.xlane.f32.xlu0 %v502_v6  ;;  %v944_v10 = vpop.f32.mrb[7].mxu0 }
 0x32c   : > { %510 = vadd.xlane.f32.xlu1 %v505_v9 }
 0x3b7   : > { %v509_v11 = vpop.xlane.xlu0 %508 }
 0x3b8   : > { %v513_v12 = vmul.f32 0.0078125, %v509_v11 }
 0x3b9   : > { %v511_v13 = vpop.xlane.xlu1 %510 }
 0x3ba   : > { %v515_v17 = vsub.f32 %v502_v6, %v513_v12  ;;  %v514_v18 = vmul.f32 0.0078125, %v511_v13  ;;  %v1018_v13 = vld [vmem:[%s1267_s4] sm:$0xff]  }
 0x3bc   : > { %v516_v19 = vsub.f32 %v505_v9, %v514_v18  ;;  %v517_v20 = vmul.f32 %v515_v17, %v515_v17  ;;  %v1020_v18 = vld [vmem:[%s1267_s4 + $0x10] sm:$0xff]  }
 0x3be   : > { %519 = vadd.xlane.f32.xlu0 %v517_v20  ;;  %v518_v21 = vmul.f32 %v516_v19, %v516_v19  ;;  %v1022_v20 = vld [vmem:[%s1267_s4 + $0x20] sm:$0xff]  }
 0x3c0   : > { %521 = vadd.xlane.f32.xlu1 %v518_v21  ;;  %v1023_v21 = vld [vmem:[%s1267_s4 + $0x28] sm:$0xff]  }
 0x44b   : > { %v520_v30 = vpop.xlane.xlu0 %519 }
 0x44c   : > { %v523_v31 = vmul.f32 0.0078125, %v520_v30  ;;  %v687_v30 = vsub.s32 7, %v1142_v14 }
 0x44d   : > { %v522_v32 = vpop.xlane.xlu1 %521 }
 0x44e   : > { %v525_v33 = vadd.f32 1e-05, %v523_v31  ;;  %v524_v34 = vmul.f32 0.0078125, %v522_v32  ;;  %v260_v31 = vld [vmem:[%s1268_s5 + $0x8] sm:$0xff]  ;;  %v688_v32 = vrot.slane %v1148_v16, %v687_v30 }
 0x450   : > { %1034 = vrsqrt.f32 %v525_v33  ;;  %v526_v35 = vadd.f32 1e-05, %v524_v34 }
 0x452   : > { %1036 = vrsqrt.f32 %v526_v35 }
 0x45a   : > { %v1035_v40 = vpop.eup %1034 }
 0x45b   : > { %v529_v41 = vmul.f32 %v1035_v40, %v515_v17  ;;  %v1019_v17 = vld [vmem:[%s1267_s4 + $0x8] sm:$0xff]  }
 0x45c   : > { %v1037_v43 = vpop.eup %1036 }
 0x45d   : > { %v530_v45 = vmul.f32 %v1037_v43, %v516_v19  ;;  %v535_v46 = vmul.f32 %v534_v39, %v529_v41  ;;  %v1021_v19 = vld [vmem:[%s1267_s4 + $0x18] sm:$0xff]  }
 0x45f   : > { %v536_v47 = vmul.f32 %v534_v39, %v530_v45  ;;  %v541_v48 = vadd.f32 %v540_v42, %v535_v46 }
 0x461   : > { %v542_v49 = vadd.f32 %v540_v42, %v536_v47  ;;  %v545_v50 = vmul.f32 0.70710677, %v541_v48  ;;  %v543_v55 = vmul.f32 0.5, %v541_v48 }
 0x463   : > { %v546_v51 = vmul.f32 0.70710677, %v542_v49  ;;  %1038 = verf.f32 %v545_v50  ;;  %v544_v56 = vmul.f32 0.5, %v542_v49 }
 0x465   : > { %1040 = verf.f32 %v546_v51 }
 0x46d   : > { %v1039_v52 = vpop.eup %1038 }
 0x46e   : > { %v549_v53 = vadd.f32 1.0, %v1039_v52  ;;  %v727_v52 = vrot.slane %v260_v31, %v431_v44 }
 0x46f   : > { %v1041_v54 = vpop.eup %1040 }
 0x470   : > { %v550_v57 = vadd.f32 1.0, %v1041_v54  ;;  %v551_v58 = vmul.f32 %v549_v53, %v543_v55 }
 0x472   : > { %v552_v59 = vmul.f32 %v550_v57, %v544_v56 }
 0x474   : > { %v553_v60 = vpack.c.bf16 %v552_v59, %v551_v58 }
 0x476   : > { %962 = vmatmul.mubr.bf16.vlgmr.msra.gmra.mrb[0].mxu1 %v553_v60 }
 0x477   : > { %981 = vmatprep.mubr.msk.bf16.mxu1 %vm1060_vm2, %v1059_v37  ;;  %966 = vmatpush3.bf16.msra.mxu1 %v1018_v13 }
 0x478   : > { %967 = vmatprep.subr.bf16.mxu1 %v1059_v37 }
 0x47b   : > { %968 = vmatpush3.bf16.msra.mxu1 %v1019_v17 }
 0x47c   : > { %969 = vmatprep.subr.bf16.mxu1 %v1059_v37 }
 0x47f   : > { %970 = vmatpush3.bf16.msra.mxu1 %v1020_v18 }
 0x480   : > { %971 = vmatprep.subr.bf16.mxu1 %v1059_v37 }
 0x483   : > { %972 = vmatpush3.bf16.msra.mxu1 %v1021_v19 }
 0x484   : > { %973 = vmatprep.subr.bf16.mxu1 %v1059_v37 }
 0x487   : > { %974 = vmatpush3.bf16.msra.mxu1 %v1022_v20 }
 0x488   : > { %975 = vmatprep.subr.bf16.mxu1 %v1059_v37 }
 0x48b   : > { %976 = vmatpush3.bf16.msra.mxu1 %v1023_v21 }
 0x48c   : > { %977 = vmatprep.subr.bf16.mxu1 %v1059_v37 }
 0x48f   : > { %978 = vmatpush3.bf16.msra.mxu1 %v1024_v22 }
 0x490   : > { %979 = vmatprep.subr.bf16.mxu1 %v1059_v37  ;;  %v694_v37 = vrot.slane %v260_v31, %v285_v15 }
 0x493   : > { %980 = vmatpush3.bf16.msra.mxu1 %v1025_v23 }
 0x549   : > { %v656_v63 = vpop.f32.mrb[0].mxu1 }
 0x54a   : > { %v657_v0 = vadd.f32 %v656_v63, %v573_v62  ;;  %v963_v1 = vpop.f32.mrb[1].mxu1 }
 0x54b   : > { %v659_v2 = vpop.f32.mrb[2].mxu1 }
 0x54c   : > { %v660_v3 = vadd.f32 %v659_v2, %v573_v62  ;;  %663 = vadd.xlane.f32.xlu0 %v657_v0  ;;  %v964_v4 = vpop.f32.mrb[3].mxu1 }
 0x54e   : > { %665 = vadd.xlane.f32.xlu1 %v660_v3 }
 0x5d9   : > { %v664_v5 = vpop.xlane.xlu0 %663 }
 0x5da   : > { %v667_v6 = vmul.f32 0.0078125, %v664_v5 }
 0x5db   : > { %v666_v7 = vpop.xlane.xlu1 %665 }
 0x5dc   : > { %v669_v8 = vsub.f32 %v657_v0, %v667_v6  ;;  %v668_v9 = vmul.f32 0.0078125, %v666_v7 }
 0x5de   : > { %v670_v10 = vsub.f32 %v660_v3, %v668_v9  ;;  %v671_v11 = vmul.f32 %v669_v8, %v669_v8 }
 0x5e0   : > { %673 = vadd.xlane.f32.xlu0 %v671_v11  ;;  %v672_v12 = vmul.f32 %v670_v10, %v670_v10 }
 0x5e2   : > { %675 = vadd.xlane.f32.xlu1 %v672_v12 }
 0x66d   : > { %v674_v24 = vpop.xlane.xlu0 %673 }
 0x66e   : > { %v677_v25 = vmul.f32 0.0078125, %v674_v24 }
 0x66f   : > { %v676_v26 = vpop.xlane.xlu1 %675 }
 0x670   : > { %v679_v27 = vadd.f32 1e-05, %v677_v25  ;;  %v678_v28 = vmul.f32 0.0078125, %v676_v26 }
 0x672   : > { %1042 = vrsqrt.f32 %v679_v27  ;;  %v680_v29 = vadd.f32 1e-05, %v678_v28 }
 0x674   : > { %1044 = vrsqrt.f32 %v680_v29 }
 0x67c   : > { %v1043_v33 = vpop.eup %1042 }
 0x67d   : > { %v683_v34 = vmul.f32 %v1043_v33, %v669_v8 }
 0x67e   : > { %v1045_v35 = vpop.eup %1044 }
 0x67f   : > { %v689_v36 = vmul.f32 %v688_v32, %v683_v34  ;;  %v684_v38 = vmul.f32 %v1045_v35, %v670_v10 }
 0x681   : > { %v690_v39 = vmul.f32 %v688_v32, %v684_v38  ;;  %v695_v40 = vadd.f32 %v694_v37, %v689_v36 }
 0x683   : > { %v696_v41 = vadd.f32 %v694_v37, %v690_v39  ;;  %v699_v42 = vmul.f32 0.70710677, %v695_v40  ;;  %v697_v16 = vmul.f32 0.5, %v695_v40 }
 0x685   : > { %v700_v43 = vmul.f32 0.70710677, %v696_v41  ;;  %1046 = verf.f32 %v699_v42  ;;  %v698_v48 = vmul.f32 0.5, %v696_v41 }
 0x687   : > { %1048 = verf.f32 %v700_v43 }
 0x68f   : > { %v1047_v45 = vpop.eup %1046 }
 0x690   : > { %v703_v46 = vadd.f32 1.0, %v1047_v45 }
 0x691   : > { %v1049_v47 = vpop.eup %1048 }
 0x692   : > { %v704_v49 = vadd.f32 1.0, %v1049_v47  ;;  %v705_v50 = vmul.f32 %v703_v46, %v697_v16 }
 0x694   : > { %v706_v15 = vmul.f32 %v704_v49, %v698_v48 }
 0x696   : > { %v707_v51 = vpack.c.bf16 %v706_v15, %v705_v50 }
 0x698   : > { %982 = vmatmul.mubr.bf16.vlgmr.msra.gmra.mrb[4].mxu1 %v707_v51 }
 0x76b   : > { %v810_v53 = vpop.f32.mrb[4].mxu1 }
 0x76c   : > { %v811_v54 = vadd.f32 %v810_v53, %v727_v52  ;;  %v983_v55 = vpop.f32.mrb[5].mxu1 }
 0x76d   : > { %v813_v56 = vpop.f32.mrb[6].mxu1 }
 0x76e   : > { %817 = vst [vmem:[%s256_s23] sm:$0xff] %v811_v54  ;;  %v814_v57 = vadd.f32 %v813_v56, %v727_v52  ;;  %v984_v58 = vpop.f32.mrb[7].mxu1 }
 0x770   : > { %818 = vst [vmem:[%s256_s23 + $0x8] sm:$0xff] %v814_v57 }
 0x771 PF: > { %s16_s21 = sadd.s32 1, %s1056_s21  }
 0x772   : > { %p13_p4 = scmp.ge.s32.totalorder %s16_s21, 4  }
 0x774   :  { %15 = sbr.rel (!%p13_p4) target bundleno = 1 (0x1), region = 74 }

// kernel: speech_recognition_forward.3
= control target key start
LH: loop header
LB: loop body
LE: loop exit
PB: predicated region body
PF: predicated region fallthrough
CT: control target
= control target key end

     0   :  { %v36_v0 = vlaneseq  ;;  %s1033_s0 = inlined_call_operand.vmem [shape: f32[9,8,128], index: 0, kind: input, shape index: {}]   ;;  %s1034_s1 = inlined_call_operand.vmem [shape: f32[8,32], index: 1, kind: input, shape index: {}]   ;;  %s1035_s2 = inlined_call_operand.vmem [shape: f32[8,32], index: 2, kind: input, shape index: {}]   ;;  %s1036_s3 = inlined_call_operand.vmem [shape: f32[32,128], index: 3, kind: input, shape index: {}]   ;;  %s1037_s4 = inlined_call_operand.vmem [shape: f32[1,32], index: 4, kind: input, shape index: {}]   ;;  %s1038_s5 = inlined_call_operand.vmem [shape: f32[1,32], index: 5, kind: input, shape index: {}]   ;;  %s1039_s6 = inlined_call_operand.vmem [shape: f32[32,128], index: 6, kind: input, shape index: {}]   ;;  %s1040_s7 = inlined_call_operand.vmem [shape: f32[1,128], index: 7, kind: input, shape index: {}]   ;;  %s1041_s8 = inlined_call_operand.vmem [shape: f32[72,128], index: 8, kind: output, shape index: {0}]   ;;  %s1042_s9 = inlined_call_operand.vmem [shape: f32[8,32], index: 9, kind: output, shape index: {1}]   ;;  %s1043_s10 = inlined_call_operand.vmem [shape: f32[8,32], index: 10, kind: output, shape index: {2}]  }
   0x1   :  { %v824_v1 = vld [vmem:[%s1036_s3] sm:$0xff]  ;;  %v829_v2 = vld [vmem:[%s1036_s3 + $0x8] sm:$0xff]  ;;  %v834_v3 = vld [vmem:[%s1036_s3 + $0x10] sm:$0xff] }
   0x2   :  { %v839_v4 = vld [vmem:[%s1036_s3 + $0x18] sm:$0xff]  ;;  %v37_v5 = vand.u32 127, %v36_v0  ;;  %v41_v6 = vld [vmem:[%s1034_s1] sm:$0xff]   ;;  %s855_s3 = smov 0  }
   0x3   :  { %v42_v7 = vld [vmem:[%s1035_s2] sm:$0xff]  }
   0x4   :  { %vm38_vm0 = vcmp.ge.s32.totalorder %v37_v5, 64  ;;  %vm39_vm1 = vcmp.lt.s32.totalorder %v37_v5, 96 }
   0x5   :  { %vm847_vm2 = vmand %vm38_vm0, %vm39_vm1 }
   0x6 LB: > { %v643_v9 = vpack.c.bf16 %v829_v2, %v824_v1  ;;  %v757_v10 = vmov 0.0|0.0   ;;  %v646_v11 = vpack.c.bf16 %v839_v4, %v834_v3  ;;  %vm758_vm3 = vmmov 0   ;;  %s562_s1 = sshll.u32 %s755_s3, 3  ;;  %s760_s27 = smov 64   ;;  %s755_s3 = sphi %s855_s3, %s48_s3   ;;  %v751_v6 = vphi %v41_v6, %v1047_v6   ;;  %v747_v7 = vphi %v42_v7, %v1046_v7  }
   0x7   : > { %642 = vmatprep.subr.bf16.mxu0 %v757_v10  ;;  %v759_v12 = vmov 0.0   ;;  %vm54_vm4 = vcmask 261120   ;;  %s52_s26 = scalar_lea.vmem %s1033_s0, %s562_s1  ;;  %s761_s28 = smov 32  }
   0x8   : > { %644 = vmatpush3.bf16.msra.mxu0 %v643_v9  ;;  %604 = vmatprep.mubr.msk.f32.mxu0 %vm758_vm3, %v759_v12  ;;  %v53_v13 = vld [vmem:[%s52_s26] sm:$0xff]  ;;  %s762_s29 = smov 96   ;;  %s165_s30 = scalar_lea.vmem [#allocation2], %s562_s1 }
   0x9   : > { %645 = vmatprep.subr.bf16.mxu0 %v757_v10  ;;  %s48_s3 = sadd.s32 1, %s755_s3  }
   0xa   : > { %p45_p0 = scmp.ge.s32.totalorder %s48_s3, 9  }
   0xb   :  { %vm764_vm5 = vmmov (%p45_p0), 0  }
   0xc   : > { %647 = vmatpush3.bf16.msra.mxu0 %v646_v11 }
   0xf   : > { %605 = vmatmul.mubr.msk.f32.vlgmr.msra.gmra.mrb[0].mxu0 %vm54_vm4, %v751_v6 }
  0xe2   : > { %v124_v14 = vpop.f32.mrb[0].mxu0 }
  0xe3   : > { %v128_v15 = vadd.f32 %v124_v14, %v53_v13  ;;  %v606_v16 = vpop.f32.mrb[1].mxu0 }
  0xe5   : > { %v129_v17 = vmul.f32 2.0, %v128_v15 }
  0xe7   : > { %v130_v18 = vsel %vm847_vm2, %v129_v17, %v128_v15 }
  0xe8   : > { %v564_v19 = vmul.f32 -1.442695, %v130_v18 }
  0xea   : > { %691 = vpow2.f32 %v564_v19 }
  0xf4   : > { %v692_v20 = vpop.eup %691 }
  0xf5   : > { %v134_v21 = vadd.f32 1.0, %v692_v20 }
  0xf7   : > { %693 = vrcp.f32 %v134_v21 }
 0x101   : > { %v694_v22 = vpop.eup %693 }
 0x102   : > { %v137_v23 = vmul.f32 2.0, %v694_v22 }
 0x104   : > { %v565_v24 = vadd.f32 -1.0, %v137_v23 }
 0x106   : > { %v139_v25 = vsel %vm847_vm2, %v565_v24, %v694_v22 }
 0x107   : > { %146 = vrot.lane.b32.xlu0 %v139_v25, %s760_s27 }
 0x10b   : > { %141 = vrot.lane.b32.xlu0 %v747_v7, %s761_s28 }
 0x179   : > { %v147_v26 = vpop.permute.xlu0 %146 }
 0x17a   : > { %v149_v27 = vmul.f32 %v147_v26, %v139_v25 }
 0x17c   : > { %151 = vrot.lane.b32.xlu1 %v149_v27, %s761_s28 }
 0x17d   : > { %v142_v28 = vpop.permute.xlu0 %141 }
 0x17e   : > { %v144_v29 = vmul.f32 %v142_v28, %v139_v25 }
 0x1ee   : > { %v152_v30 = vpop.permute.xlu1 %151 }
 0x1ef   : > { %v154_v31 = vadd.f32 %v152_v30, %v144_v29 }
 0x1f1   : > { %695 = vtanh.f32 %v154_v31 }
 0x1fb   : > { %v696_v32 = vpop.eup %695 }
 0x1fc   : > { %157 = vrot.lane.b32.xlu1 %v696_v32, %s760_s27 }
 0x200   : > { %168 = vrot.lane.b32.xlu1 %v154_v31, %s762_s29 }
 0x26e   : > { %v158_v33 = vpop.permute.xlu1 %157 }
 0x26f   : > { %v160_v34 = vmul.f32 %v158_v33, %v139_v25 }
 0x271   : > { %162 = vrot.lane.b32.xlu0 %v160_v34, %s761_s28 }
 0x272   : > { %v169_v35 = vpop.permute.xlu1 %168  }
 0x273   : > { %v1046_v7 = vmov %v169_v35  ;;  %173 = vst.msk [vmem:[%s1043_s10] sm:$0xff] (%p45_p0), %vm54_vm4, %v169_v35 }
 0x2de   :  { %47 = sbr.rel (!%p45_p0) target bundleno = 6 (0x6), region = 77 }
 0x2e3   : > { %v163_v36 = vpop.permute.xlu0 %162  }
 0x2e4   : > { %166 = vst.msk [vmem:[%s165_s30] sm:$0xff] %vm54_vm4, %v163_v36  ;;  %v1047_v6 = vmov %v163_v36  ;;  %172 = vst.msk [vmem:[%s1042_s9] sm:$0xff] (%p45_p0), %vm54_vm4, %v163_v36  ;;  %v378_v36 = vld [vmem:[%s1039_s6] sm:$0xff] (%p45_p0) }
 0x2eb   :  { %v174_v37 = vld [vmem:[#allocation2] sm:$0xff]  ;;  %v179_v38 = vld [vmem:[#allocation2 + $0x28] sm:$0xff]  ;;  %v176_v42 = vld [vmem:[#allocation2 + $0x10] sm:$0xff] }
 0x2ec   :  { %v175_v39 = vld [vmem:[#allocation2 + $0x8] sm:$0xff]  ;;  %v185_v40 = vsel %vm54_vm4, %v174_v37, 0.0  ;;  %v200_v41 = vsel %vm54_vm4, %v179_v38, 0.0  ;;  %v191_v44 = vsel %vm54_vm4, %v176_v42, 0.0  ;;  %v180_v45 = vld [vmem:[#allocation2 + $0x30] sm:$0xff]  ;;  %v177_v46 = vld [vmem:[#allocation2 + $0x18] sm:$0xff] }
 0x2ed   :  { %186 = vadd.xlane.f32.xlu0 %v185_v40  ;;  %201 = vadd.xlane.f32.xlu1 %v200_v41  ;;  %v188_v43 = vsel %vm54_vm4, %v175_v39, 0.0  ;;  %v203_v47 = vsel %vm54_vm4, %v180_v45, 0.0  ;;  %v194_v48 = vsel %vm54_vm4, %v177_v46, 0.0  ;;  %v181_v49 = vld [vmem:[#allocation2 + $0x38] sm:$0xff]  ;;  %v178_v50 = vld [vmem:[#allocation2 + $0x20] sm:$0xff]  ;;  %v380_v40 = vld [vmem:[%s1039_s6 + $0x10] sm:$0xff] }
 0x2ee   :  { %v206_v51 = vsel %vm54_vm4, %v181_v49, 0.0  ;;  %v197_v52 = vsel %vm54_vm4, %v178_v50, 0.0  ;;  %v182_v53 = vld [vmem:[#allocation2 + $0x40] sm:$0xff]  ;;  %v381_v41 = vld [vmem:[%s1039_s6 + $0x18] sm:$0xff] }
 0x2ef   :  { %v209_v54 = vsel %vm54_vm4, %v182_v53, 0.0 }
 0x2f1   :  { %189 = vadd.xlane.f32.xlu0 %v188_v43  ;;  %192 = vadd.xlane.f32.xlu1 %v191_v44  ;;  %v765_v43 = vmov 0.0  }
 0x2f2   :  { %615 = vmatprep.mubr.msk.f32.mxu0 %vm764_vm5, %v765_v43  ;;  %630 = vmatprep.mubr.msk.f32.mxu1 %vm764_vm5, %v765_v43 }
 0x2f5   :  { %204 = vadd.xlane.f32.xlu0 %v203_v47  ;;  %195 = vadd.xlane.f32.xlu1 %v194_v48 }
 0x2f9   :  { %207 = vadd.xlane.f32.xlu0 %v206_v51  ;;  %198 = vadd.xlane.f32.xlu1 %v197_v52 }
 0x2fd   :  { %210 = vadd.xlane.f32.xlu0 %v209_v54 }
 0x37a   :  { %v187_v55 = vpop.xlane.xlu0 %186  ;;  %v202_v56 = vpop.xlane.xlu1 %201 }
 0x37b   :  { %v213_v57 = vmul.f32 0.03125, %v187_v55  ;;  %v218_v58 = vmul.f32 0.03125, %v202_v56 }
 0x37d   :  { %v904_v59 = vsub.f32 %v174_v37, %v213_v57  ;;  %v906_v60 = vsub.f32 %v179_v38, %v218_v58  ;;  %v379_v37 = vld [vmem:[%s1039_s6 + $0x8] sm:$0xff] }
 0x37e   :  { %v190_v61 = vpop.xlane.xlu0 %189  ;;  %v193_v62 = vpop.xlane.xlu1 %192  ;;  %v649_v38 = vpack.c.bf16 %v379_v37, %v378_v36 }
 0x37f   :  { %v214_v63 = vmul.f32 0.03125, %v190_v61  ;;  %v215_v0 = vmul.f32 0.03125, %v193_v62  ;;  %v231_v1 = vmul.f32 %v904_v59, %v904_v59  ;;  %v236_v2 = vmul.f32 %v906_v60, %v906_v60 }
 0x381   :  { %v912_v3 = vsub.f32 %v175_v39, %v214_v63  ;;  %v914_v4 = vsub.f32 %v176_v42, %v215_v0  ;;  %v240_v5 = vsel %vm54_vm4, %v231_v1, 0.0  ;;  %v255_v8 = vsel %vm54_vm4, %v236_v2, 0.0 }
 0x382   :  { %241 = vadd.xlane.f32.xlu1 %v240_v5  ;;  %v205_v6 = vpop.xlane.xlu0 %204  ;;  %v196_v7 = vpop.xlane.xlu1 %195  ;;  %v763_v39 = vmov 0.0|0.0   ;;  %v652_v42 = vpack.c.bf16 %v381_v41, %v380_v40 }
 0x383   :  { %v219_v9 = vmul.f32 0.03125, %v205_v6  ;;  %v216_v10 = vmul.f32 0.03125, %v196_v7  ;;  %v232_v11 = vmul.f32 %v912_v3, %v912_v3  ;;  %v233_v12 = vmul.f32 %v914_v4, %v914_v4  ;;  %648 = vmatprep.subr.bf16.mxu0 %v763_v39  ;;  %654 = vmatprep.subr.bf16.mxu1 %v763_v39  ;;  %v566_v6 = vld [vmem:[%s1037_s4] ss:$0 sm:$0xff] }
 0x384   :  { %650 = vmatpush3.bf16.msra.mxu0 %v649_v38  ;;  %656 = vmatpush3.bf16.msra.mxu1 %v649_v38 }
 0x385   :  { %v922_v13 = vsub.f32 %v180_v45, %v219_v9  ;;  %v924_v14 = vsub.f32 %v177_v46, %v216_v10  ;;  %v243_v15 = vsel %vm54_vm4, %v232_v11, 0.0  ;;  %v246_v18 = vsel %vm54_vm4, %v233_v12, 0.0  ;;  %651 = vmatprep.subr.bf16.mxu0 %v763_v39  ;;  %655 = vmatprep.subr.bf16.mxu1 %v763_v39  ;;  %v567_v12 = vld [vmem:[%s1038_s5] ss:$0 sm:$0xff] }
 0x386   :  { %256 = vadd.xlane.f32.xlu1 %v255_v8  ;;  %244 = vadd.xlane.f32.xlu0 %v243_v15  ;;  %v208_v16 = vpop.xlane.xlu0 %207  ;;  %v199_v17 = vpop.xlane.xlu1 %198 }
 0x387   :  { %v220_v19 = vmul.f32 0.03125, %v208_v16  ;;  %v217_v20 = vmul.f32 0.03125, %v199_v17  ;;  %v237_v21 = vmul.f32 %v922_v13, %v922_v13  ;;  %v234_v22 = vmul.f32 %v924_v14, %v924_v14 }
 0x388   :  { %653 = vmatpush3.bf16.msra.mxu0 %v652_v42  ;;  %657 = vmatpush3.bf16.msra.mxu1 %v652_v42 }
 0x389   :  { %v932_v23 = vsub.f32 %v181_v49, %v220_v19  ;;  %v934_v24 = vsub.f32 %v178_v50, %v217_v20  ;;  %v258_v25 = vsel %vm54_vm4, %v237_v21, 0.0  ;;  %v249_v28 = vsel %vm54_vm4, %v234_v22, 0.0 }
 0x38a   :  { %247 = vadd.xlane.f32.xlu0 %v246_v18  ;;  %259 = vadd.xlane.f32.xlu1 %v258_v25  ;;  %v211_v26 = vpop.xlane.xlu0 %210 }
 0x38b   :  { %v221_v27 = vmul.f32 0.03125, %v211_v26  ;;  %v238_v29 = vmul.f32 %v932_v23, %v932_v23  ;;  %v235_v30 = vmul.f32 %v934_v24, %v934_v24 }
 0x38d   :  { %v942_v31 = vsub.f32 %v182_v53, %v221_v27  ;;  %v261_v32 = vsel %vm54_vm4, %v238_v29, 0.0  ;;  %v252_v33 = vsel %vm54_vm4, %v235_v30, 0.0 }
 0x38e   :  { %250 = vadd.xlane.f32.xlu0 %v249_v28  ;;  %262 = vadd.xlane.f32.xlu1 %v261_v32 }
 0x38f   :  { %v239_v34 = vmul.f32 %v942_v31, %v942_v31 }
 0x391   :  { %v264_v35 = vsel %vm54_vm4, %v239_v34, 0.0 }
 0x392   :  { %253 = vadd.xlane.f32.xlu0 %v252_v33  ;;  %265 = vadd.xlane.f32.xlu1 %v264_v35 }
 0x40f   :  { %v242_v44 = vpop.xlane.xlu1 %241 }
 0x410   :  { %v267_v45 = vmul.f32 0.03125, %v242_v44 }
 0x412   :  { %v276_v46 = vadd.f32 1e-05, %v267_v45 }
 0x413   :  { %v257_v47 = vpop.xlane.xlu1 %256  ;;  %v245_v48 = vpop.xlane.xlu0 %244 }
 0x414   :  { %697 = vrsqrt.f32 %v276_v46  ;;  %v272_v49 = vmul.f32 0.03125, %v257_v47  ;;  %v268_v50 = vmul.f32 0.03125, %v245_v48 }
 0x416   :  { %v281_v51 = vadd.f32 1e-05, %v272_v49  ;;  %v277_v52 = vadd.f32 1e-05, %v268_v50 }
 0x417   :  { %v260_v53 = vpop.xlane.xlu1 %259  ;;  %v248_v54 = vpop.xlane.xlu0 %247 }
 0x418   :  { %699 = vrsqrt.f32 %v281_v51  ;;  %v273_v55 = vmul.f32 0.03125, %v260_v53  ;;  %v269_v56 = vmul.f32 0.03125, %v248_v54 }
 0x419   :  { %701 = vrsqrt.f32 %v277_v52 }
 0x41a   :  { %v282_v57 = vadd.f32 1e-05, %v273_v55  ;;  %v278_v58 = vadd.f32 1e-05, %v269_v56 }
 0x41b   :  { %v263_v61 = vpop.xlane.xlu1 %262  ;;  %v251_v62 = vpop.xlane.xlu0 %250 }
 0x41c   :  { %703 = vrsqrt.f32 %v282_v57  ;;  %v274_v63 = vmul.f32 0.03125, %v263_v61  ;;  %v270_v0 = vmul.f32 0.03125, %v251_v62 }
 0x41d   :  { %705 = vrsqrt.f32 %v278_v58 }
 0x41e   :  { %v698_v1 = vpop.eup %697  ;;  %v283_v2 = vadd.f32 1e-05, %v274_v63  ;;  %v279_v5 = vadd.f32 1e-05, %v270_v0 }
 0x41f   :  { %v266_v7 = vpop.xlane.xlu1 %265  ;;  %v254_v8 = vpop.xlane.xlu0 %253  ;;  %v294_v9 = vmul.f32 %v698_v1, %v904_v59 }
 0x420   :  { %707 = vrsqrt.f32 %v283_v2  ;;  %v275_v10 = vmul.f32 0.03125, %v266_v7  ;;  %v271_v11 = vmul.f32 0.03125, %v254_v8 }
 0x421   :  { %709 = vrsqrt.f32 %v279_v5  ;;  %v309_v15 = vmul.f32 %v566_v6, %v294_v9 }
 0x422   :  { %v700_v16 = vpop.eup %699  ;;  %v284_v17 = vadd.f32 1e-05, %v275_v10  ;;  %v280_v18 = vadd.f32 1e-05, %v271_v11 }
 0x423   :  { %v702_v19 = vpop.eup %701  ;;  %v324_v20 = vadd.f32 %v567_v12, %v309_v15  ;;  %v299_v21 = vmul.f32 %v700_v16, %v906_v60 }
 0x424   :  { %711 = vrsqrt.f32 %v284_v17  ;;  %v295_v22 = vmul.f32 %v702_v19, %v912_v3 }
 0x425   :  { %713 = vrsqrt.f32 %v280_v18  ;;  %v342_v59 = vmul.f32 0.70710677, %v324_v20  ;;  %v314_v25 = vmul.f32 %v566_v6, %v299_v21  ;;  %v333_v53 = vmul.f32 0.5, %v324_v20 }
 0x426   :  { %v704_v26 = vpop.eup %703  ;;  %v310_v27 = vmul.f32 %v566_v6, %v295_v22 }
 0x427   :  { %v706_v28 = vpop.eup %705  ;;  %715 = verf.f32 %v342_v59  ;;  %v329_v29 = vadd.f32 %v567_v12, %v314_v25  ;;  %v300_v30 = vmul.f32 %v704_v26, %v922_v13 }
 0x428   :  { %v325_v32 = vadd.f32 %v567_v12, %v310_v27  ;;  %v296_v33 = vmul.f32 %v706_v28, %v914_v4 }
 0x429   :  { %v347_v34 = vmul.f32 0.70710677, %v329_v29  ;;  %v315_v35 = vmul.f32 %v566_v6, %v300_v30 }
 0x42a   :  { %v708_v36 = vpop.eup %707  ;;  %v343_v60 = vmul.f32 0.70710677, %v325_v32  ;;  %v311_v37 = vmul.f32 %v566_v6, %v296_v33  ;;  %v334_v1 = vmul.f32 0.5, %v325_v32 }
 0x42b   :  { %v710_v38 = vpop.eup %709  ;;  %717 = verf.f32 %v347_v34  ;;  %v330_v3 = vadd.f32 %v567_v12, %v315_v35  ;;  %v301_v39 = vmul.f32 %v708_v36, %v932_v23  ;;  %v568_v35 = vld [vmem:[%s1040_s7] ss:$0 sm:$0xff] }
 0x42c   :  { %719 = verf.f32 %v343_v60  ;;  %v326_v40 = vadd.f32 %v567_v12, %v311_v37  ;;  %v297_v41 = vmul.f32 %v710_v38, %v924_v14 }
 0x42d   :  { %v348_v42 = vmul.f32 0.70710677, %v330_v3  ;;  %v316_v44 = vmul.f32 %v566_v6, %v301_v39  ;;  %v339_v9 = vmul.f32 0.5, %v330_v3 }
 0x42e   :  { %v712_v13 = vpop.eup %711  ;;  %v344_v45 = vmul.f32 0.70710677, %v326_v40  ;;  %v312_v46 = vmul.f32 %v566_v6, %v297_v41  ;;  %v335_v11 = vmul.f32 0.5, %v326_v40 }
 0x42f   :  { %v714_v4 = vpop.eup %713  ;;  %v302_v47 = vmul.f32 %v712_v13, %v942_v31  ;;  %721 = verf.f32 %v348_v42  ;;  %v331_v48 = vadd.f32 %v567_v12, %v316_v44 }
 0x430   :  { %v298_v49 = vmul.f32 %v714_v4, %v934_v24  ;;  %723 = verf.f32 %v344_v45  ;;  %v327_v50 = vadd.f32 %v567_v12, %v312_v46  ;;  %v338_v24 = vmul.f32 0.5, %v329_v29 }
 0x431   :  { %v716_v51 = vpop.eup %715  ;;  %v349_v23 = vmul.f32 0.70710677, %v331_v48  ;;  %v317_v52 = vmul.f32 %v566_v6, %v302_v47  ;;  %v340_v19 = vmul.f32 0.5, %v331_v48 }
 0x432   :  { %v360_v54 = vadd.f32 1.0, %v716_v51  ;;  %v345_v14 = vmul.f32 0.70710677, %v327_v50  ;;  %v313_v55 = vmul.f32 %v566_v6, %v298_v49  ;;  %v336_v21 = vmul.f32 0.5, %v327_v50 }
 0x433   :  { %725 = verf.f32 %v349_v23  ;;  %v332_v56 = vadd.f32 %v567_v12, %v317_v52 }
 0x434   :  { %v369_v57 = vmul.f32 %v360_v54, %v333_v53  ;;  %727 = verf.f32 %v345_v14  ;;  %v328_v58 = vadd.f32 %v567_v12, %v313_v55 }
 0x435   :  { %v718_v61 = vpop.eup %717  ;;  %v350_v31 = vmul.f32 0.70710677, %v332_v56  ;;  %v341_v28 = vmul.f32 0.5, %v332_v56 }
 0x436   :  { %v720_v62 = vpop.eup %719  ;;  %616 = vmatmul.mubr.msk.f32.vlgmr.msra.gmra.mrb[0].mxu0 %vm54_vm4, %v369_v57  ;;  %v365_v63 = vadd.f32 1.0, %v718_v61  ;;  %v346_v0 = vmul.f32 0.70710677, %v328_v58  ;;  %v337_v30 = vmul.f32 0.5, %v328_v58 }
 0x437   :  { %618 = vmatprep.mubr.msk.f32.mxu0 %vm764_vm5, %v765_v43  ;;  %v361_v2 = vadd.f32 1.0, %v720_v62  ;;  %729 = verf.f32 %v350_v31 }
 0x438   :  { %v374_v5 = vmul.f32 %v365_v63, %v338_v24  ;;  %731 = verf.f32 %v346_v0 }
 0x439   :  { %v722_v6 = vpop.eup %721  ;;  %v370_v7 = vmul.f32 %v361_v2, %v334_v1 }
 0x43a   :  { %v724_v8 = vpop.eup %723  ;;  %631 = vmatmul.mubr.msk.f32.vlgmr.msra.gmra.mrb[0].mxu1 %vm54_vm4, %v374_v5  ;;  %v366_v10 = vadd.f32 1.0, %v722_v6 }
 0x43b   :  { %619 = vmatmul.mubr.msk.f32.gmra.mrb[2].mxu0 %vm54_vm4, %v370_v7  ;;  %633 = vmatprep.mubr.msk.f32.mxu1 %vm764_vm5, %v765_v43  ;;  %v362_v12 = vadd.f32 1.0, %v724_v8 }
 0x43c   :  { %621 = vmatprep.mubr.msk.f32.mxu0 %vm764_vm5, %v765_v43  ;;  %v375_v15 = vmul.f32 %v366_v10, %v339_v9 }
 0x43d   :  { %v726_v16 = vpop.eup %725  ;;  %v371_v17 = vmul.f32 %v362_v12, %v335_v11 }
 0x43e   :  { %v728_v18 = vpop.eup %727  ;;  %634 = vmatmul.mubr.msk.f32.gmra.mrb[2].mxu1 %vm54_vm4, %v375_v15  ;;  %v367_v20 = vadd.f32 1.0, %v726_v16 }
 0x43f   :  { %622 = vmatmul.mubr.msk.f32.gmra.mrb[4].mxu0 %vm54_vm4, %v371_v17  ;;  %636 = vmatprep.mubr.msk.f32.mxu1 %vm764_vm5, %v765_v43  ;;  %v363_v22 = vadd.f32 1.0, %v728_v18 }
 0x440   :  { %624 = vmatprep.mubr.msk.f32.mxu0 %vm764_vm5, %v765_v43  ;;  %v376_v59 = vmul.f32 %v367_v20, %v340_v19 }
 0x441   :  { %v730_v25 = vpop.eup %729  ;;  %v372_v26 = vmul.f32 %v363_v22, %v336_v21 }
 0x442   :  { %v732_v27 = vpop.eup %731  ;;  %637 = vmatmul.mubr.msk.f32.gmra.mrb[4].mxu1 %vm54_vm4, %v376_v59  ;;  %v368_v29 = vadd.f32 1.0, %v730_v25 }
 0x443   :  { %625 = vmatmul.mubr.msk.f32.gmra.mrb[6].mxu0 %vm54_vm4, %v372_v26  ;;  %639 = vmatprep.mubr.msk.f32.mxu1 %vm764_vm5, %v765_v43  ;;  %v364_v32 = vadd.f32 1.0, %v732_v27 }
 0x444   :  { %627 = vmatprep.mubr.msk.f32.mxu0 %vm764_vm5, %v765_v43  ;;  %v377_v33 = vmul.f32 %v368_v29, %v341_v28 }
 0x445   :  { %v373_v34 = vmul.f32 %v364_v32, %v337_v30 }
 0x446   :  { %640 = vmatmul.mubr.msk.f32.gmra.mrb[6].mxu1 %vm54_vm4, %v377_v33 }
 0x447   :  { %628 = vmatmul.mubr.msk.f32.gmra.mrb[8].mxu0 %vm54_vm4, %v373_v34 }
 0x509   :  { %v482_v36 = vpop.f32.mrb[0].mxu0 }
 0x50a   :  { %v483_v60 = vadd.f32 %v568_v35, %v482_v36  ;;  %v617_v37 = vpop.f32.mrb[1].mxu0 }
 0x50c   :  { %526 = vst [vmem:[%s1041_s8] sm:$0xff] %v483_v60 }
 0x50d   :  { %v507_v38 = vpop.f32.mrb[0].mxu1 }
 0x50e   :  { %v487_v3 = vpop.f32.mrb[2].mxu0  ;;  %v508_v43 = vadd.f32 %v568_v35, %v507_v38  ;;  %v632_v39 = vpop.f32.mrb[1].mxu1 }
 0x50f   :  { %v488_v40 = vadd.f32 %v568_v35, %v487_v3  ;;  %v620_v41 = vpop.f32.mrb[3].mxu0 }
 0x510   :  { %531 = vst [vmem:[%s1041_s8 + $0x28] sm:$0xff] %v508_v43 }
 0x511   :  { %527 = vst [vmem:[%s1041_s8 + $0x8] sm:$0xff] %v488_v40  ;;  %v512_v42 = vpop.f32.mrb[2].mxu1 }
 0x512   :  { %v492_v44 = vpop.f32.mrb[4].mxu0  ;;  %v513_v13 = vadd.f32 %v568_v35, %v512_v42  ;;  %v635_v45 = vpop.f32.mrb[3].mxu1 }
 0x513   :  { %v493_v46 = vadd.f32 %v568_v35, %v492_v44  ;;  %v623_v4 = vpop.f32.mrb[5].mxu0 }
 0x514   :  { %532 = vst [vmem:[%s1041_s8 + $0x30] sm:$0xff] %v513_v13 }
 0x515   :  { %528 = vst [vmem:[%s1041_s8 + $0x10] sm:$0xff] %v493_v46  ;;  %v517_v47 = vpop.f32.mrb[4].mxu1 }
 0x516   :  { %v497_v48 = vpop.f32.mrb[6].mxu0  ;;  %v518_v49 = vadd.f32 %v568_v35, %v517_v47  ;;  %v638_v50 = vpop.f32.mrb[5].mxu1 }
 0x517   :  { %v498_v51 = vadd.f32 %v568_v35, %v497_v48  ;;  %v626_v23 = vpop.f32.mrb[7].mxu0 }
 0x518   :  { %533 = vst [vmem:[%s1041_s8 + $0x38] sm:$0xff] %v518_v49 }
 0x519   :  { %529 = vst [vmem:[%s1041_s8 + $0x18] sm:$0xff] %v498_v51  ;;  %v522_v52 = vpop.f32.mrb[6].mxu1 }
 0x51a   :  { %v502_v53 = vpop.f32.mrb[8].mxu0  ;;  %v523_v54 = vadd.f32 %v568_v35, %v522_v52  ;;  %v641_v14 = vpop.f32.mrb[7].mxu1 }
 0x51b   :  { %v503_v55 = vadd.f32 %v568_v35, %v502_v53  ;;  %v629_v56 = vpop.f32.mrb[9].mxu0 }
 0x51c   :  { %534 = vst [vmem:[%s1041_s8 + $0x40] sm:$0xff] %v523_v54 }
 0x51d   :  { %530 = vst [vmem:[%s1041_s8 + $0x20] sm:$0xff] %v503_v55 }

</bundles_post_ra>
